<compile_context>
chip_gen: v7x
topology: tpu7x:2x2x1
jax: 0.10.0
libtpu: 0.0.40
codegen_flags: <defaults>
</compile_context>

<pallas_src>
import functools

import jax
import jax.numpy as jnp
from jax.experimental import pallas as pl
from jax.experimental.pallas import tpu as pltpu

_NEG_SCALE = 20.0
_SMALL_FALLBACK_BYTES = 256 * 1024    # below this, custom-call overhead dominates
_MIN_BLOCK_BYTES = 512 * 1024         # don't shrink blocks below ~this when balancing
_MAX_BLOCK_BYTES = 4 * 1024 * 1024    # safety cap (x4 with double-buffered in+out)
_INV_SQRT2 = 0.7071067811865476


def _cdiv(a, b):
    return -(-a // b)


def _target_block_bytes():
    """Per-generation block-size target (bytes of input per grid step)."""
    try:
        kind = jax.devices()[0].device_kind.lower()
    except Exception:
        kind = ""
    if "v5 lite" in kind or "v5lite" in kind or "v5e" in kind:
        return 1 * 1024 * 1024   # v5e: leave headroom in the 16 MiB scoped VMEM
    if "tpu7" in kind or "v7" in kind:
        return 4 * 1024 * 1024   # v7x: amortize per-step cost at 3.2 TB/s HBM
    return 2 * 1024 * 1024       # v6e and default


def _pick_tile(extent, mult, unit_bytes, target_bytes, min_bytes):
    """Tile size (a multiple of `mult`) for one grid dimension.

    Aims at ~target_bytes per tile.  For small tile counts (< 8) the tiles are
    equalized and the count rounded up to an even number so v7x's two
    TensorCores get balanced work; tiles never shrink below ~min_bytes.
    """
    units = _cdiv(extent, mult)
    chunk = max(1, mult * unit_bytes)
    tile_u = max(1, min(units, target_bytes // chunk))
    n = _cdiv(units, tile_u)
    if n == 1:
        # Single tile: split in two when both halves stay >= min_bytes.
        if units >= 2 and units * chunk >= 2 * min_bytes:
            tile_u = _cdiv(units, 2)
    elif n < 8:
        # Few steps: equalize and prefer an even count (2-TC balance).
        if n % 2:
            n += 1
        tile_u = _cdiv(units, n)
    min_u = max(1, min(units, min_bytes // chunk))
    return max(tile_u, min_u) * mult


def _sign_gelu2_kernel(x_ref, o_ref, *, neg_scale):
    x = x_ref[...]
    # erf runs in f32 (EUP path, accuracy).  Both 0.5 factors of gelu^2 are
    # folded into the sign/scale select constant -- exact (gelu(0)^2 == 0):
    #   out = where(x < 0, -neg_scale/4, 1/4) * (x * (1 + erf(x/sqrt2)))^2
    t32 = 1.0 + jax.lax.erf(x.astype(jnp.float32) * _INV_SQRT2)
    if x.dtype.itemsize == 2 and jnp.issubdtype(x.dtype, jnp.floating):
        # Keep the cheap VPU ops in bf16/f16 (v6e/v7x VPU is 16-bit capable).
        w = jnp.where(x < 0,
                      jnp.asarray(-0.25 * neg_scale, x.dtype),
                      jnp.asarray(0.25, x.dtype))
        xt = x * t32.astype(x.dtype)
    else:
        xf = x.astype(jnp.float32)
        w = jnp.where(xf < 0.0, jnp.float32(-0.25 * neg_scale), jnp.float32(0.25))
        xt = xf * t32
    o_ref[...] = (w * xt * xt).astype(o_ref.dtype)


def _sign_gelu2_jnp(x, neg_scale):
    """Plain-XLA path for tiny / untileable inputs (same math as the kernel)."""
    xf = x.astype(jnp.float32)
    w = jnp.where(xf < 0.0, jnp.float32(-0.25 * neg_scale), jnp.float32(0.25))
    t = xf * (1.0 + jax.lax.erf(xf * _INV_SQRT2))
    return (w * t * t).astype(x.dtype)


def sign_gelu2(x, neg_scale=_NEG_SCALE, *, donate_x=False):
    """Elementwise SignGelu2.  Accepts any shape; NCHW expected from callers.

    Set donate_x=True only when the caller actually donates `x` (e.g. it is a
    dead intermediate); the output then aliases the input HBM buffer.
    """
    if x.size == 0 or x.ndim == 0:
        return _sign_gelu2_jnp(x, neg_scale)

    dtype = x.dtype
    itemsize = jnp.dtype(dtype).itemsize
    if x.size * itemsize < _SMALL_FALLBACK_BYTES:
        # Tiny tensors: custom-call + grid overhead dominates; let XLA fuse it.
        return _sign_gelu2_jnp(x, neg_scale)

    # Free relabel only: merge the leading dims, never touch the minor two dims,
    # so XLA emits NO relayout copy around the pallas_call.
    if x.ndim == 1:
        x3 = x.reshape(1, 1, x.shape[0])
    elif x.ndim == 2:
        x3 = x.reshape(1, *x.shape)
    else:
        x3 = x.reshape(-1, x.shape[-2], x.shape[-1])
    L, H, W = x3.shape

    sub_mult = max(8, 32 // itemsize)          # 8 f32 / 16 bf16 / 32 int8-fp8
    target = _target_block_bytes()
    row_bytes = W * itemsize
    slab_bytes = H * row_bytes                 # one full (H, W) slice

    # Block = (bl, bh, W).  W is always the full extent (legal for any W and it
    # matches the array's physical lane layout); bh is either the full H or a
    # sublane-aligned slice of H; bl (leading dim) is unconstrained.
    if L >= 2 and slab_bytes <= target:
        bh = H
        bl = min(L, _pick_tile(L, 1, slab_bytes, target, _MIN_BLOCK_BYTES))
    else:
        bl = 1
        if H <= sub_mult:
            bh = H
        else:
            bh = _pick_tile(H, sub_mult, row_bytes, target, _MIN_BLOCK_BYTES)
            if bh >= H:
                bh = H

    block_bytes = bl * bh * row_bytes
    if block_bytes > _MAX_BLOCK_BYTES:
        # Untileable layout (e.g. enormous W with tiny L, H); let XLA handle it.
        return _sign_gelu2_jnp(x, neg_scale)

    grid = (_cdiv(L, bl), _cdiv(H, bh))
    spec = pl.BlockSpec((bl, bh, W), lambda i, j: (i, j, 0))
    kernel = functools.partial(_sign_gelu2_kernel, neg_scale=float(neg_scale))

    out3 = pl.pallas_call(
        kernel,
        out_shape=jax.ShapeDtypeStruct((L, H, W), dtype),
        grid=grid,
        in_specs=[spec],
        out_specs=spec,
        compiler_params=pltpu.CompilerParams(
            dimension_semantics=("parallel", "parallel")),
        input_output_aliases=({0: 0} if donate_x else {}),
    )(x3)
    return out3.reshape(x.shape)


def _reference(x, neg_scale=_NEG_SCALE):
    """Literal translation of the PyTorch module (erf-based GELU)."""
    sgn = jnp.sign(x)
    sgn = jnp.where(sgn < 0, sgn * neg_scale, sgn)
    g = jax.nn.gelu(x.astype(jnp.float32), approximate=False)
    return (sgn.astype(jnp.float32) * jnp.square(g)).astype(x.dtype)


if __name__ == "__main__":
    key = jax.random.PRNGKey(0)
    k1, k2, k3 = jax.random.split(key, 3)

    # 1) Module-sized NCHW input (2,4,16,16): tiny, takes the jnp fast path.
    x = jax.random.normal(k1, (2, 4, 16, 16), dtype=jnp.float32)
    out = jax.block_until_ready(sign_gelu2(x))
    assert out.shape == x.shape and out.dtype == x.dtype
    assert jnp.allclose(out, _reference(x), atol=2e-5, rtol=1e-5)

    # 2) Lane-aligned input large enough for the Pallas path (W == 128);
    #    exercises leading-dim tiling, a balanced 2-step grid, partial block.
    x2 = jax.random.normal(k2, (7, 5, 64, 128), dtype=jnp.float32)
    out2 = jax.block_until_ready(sign_gelu2(x2))
    assert out2.shape == x2.shape and out2.dtype == x2.dtype
    assert jnp.allclose(out2, _reference(x2), atol=2e-5, rtol=1e-5)

    # 3) Awkward trailing dims (W = 100, not lane-aligned): fed as-is with full
    #    (H, W) blocks -- no pad / relayout copies.
    x3 = jax.random.normal(k3, (2, 4, 96, 100), dtype=jnp.float32)
    out3 = jax.block_until_ready(sign_gelu2(x3))
    assert out3.shape == x3.shape and out3.dtype == x3.dtype
    assert jnp.allclose(out3, _reference(x3), atol=2e-5, rtol=1e-5)

    print("KERNEL_OK")
</pallas_src>

<mosaic_0001>
module attributes {stable_mosaic.version = 11 : i64} {
  func.func @_sign_gelu2_kernel(%arg0: i32, %arg1: i32, %arg2: memref<18x64x128xf32, #tpu.memory_space<vmem>>, %arg3: memref<18x64x128xf32, #tpu.memory_space<vmem>>) attributes {dimension_semantics = [#tpu.dimension_semantics<parallel>, #tpu.dimension_semantics<parallel>], iteration_bounds = array<i64: 2, 1>, scalar_prefetch = 0 : i64, scratch_operands = 0 : i64, tpu.core_type = #tpu.core_type<tc>, window_params = [{transform_indices = @transform_0, window_bounds = array<i64: 18, 64, 128>}, {transform_indices = @transform_1, window_bounds = array<i64: 18, 64, 128>}]} {
    %c0 = arith.constant 0 : index
    %c0_0 = arith.constant 0 : index
    %c0_1 = arith.constant 0 : index
    %0 = vector.load %arg2[%c0, %c0_0, %c0_1] : memref<18x64x128xf32, #tpu.memory_space<vmem>>, vector<18x64x128xf32>
    %cst = arith.constant 0.707106769 : f32
    %1 = vector.broadcast %cst : f32 to vector<18x64x128xf32>
    %2 = arith.mulf %0, %1 : vector<18x64x128xf32>
    %3 = math.erf %2 : vector<18x64x128xf32>
    %cst_2 = arith.constant 1.000000e+00 : f32
    %4 = vector.broadcast %cst_2 : f32 to vector<18x64x128xf32>
    %5 = arith.addf %4, %3 : vector<18x64x128xf32>
    %cst_3 = arith.constant 0.000000e+00 : f32
    %6 = vector.broadcast %cst_3 : f32 to vector<18x64x128xf32>
    %7 = arith.cmpf olt, %0, %6 : vector<18x64x128xf32>
    %cst_4 = arith.constant -5.000000e+00 : f32
    %cst_5 = arith.constant 2.500000e-01 : f32
    %8 = vector.broadcast %cst_4 : f32 to vector<18x64x128xf32>
    %9 = vector.broadcast %cst_5 : f32 to vector<18x64x128xf32>
    %10 = arith.select %7, %8, %9 : vector<18x64x128xi1>, vector<18x64x128xf32>
    %11 = arith.mulf %0, %5 : vector<18x64x128xf32>
    %12 = arith.mulf %10, %11 : vector<18x64x128xf32>
    %13 = arith.mulf %12, %11 : vector<18x64x128xf32>
    %c0_6 = arith.constant 0 : index
    %c0_7 = arith.constant 0 : index
    %c0_8 = arith.constant 0 : index
    %14 = vector.load %arg3[%c0_6, %c0_7, %c0_8] : memref<18x64x128xf32, #tpu.memory_space<vmem>>, vector<18x64x128xf32>
    tpu.vector_store %arg3[%c0_6, %c0_7, %c0_8], %13 {strides = array<i32>} : memref<18x64x128xf32, #tpu.memory_space<vmem>>, vector<18x64x128xf32>,
    return
  }
  func.func @transform_0(%arg0: i32, %arg1: i32) -> (i32, i32, i32) {
    %c0_i32 = arith.constant 0 : i32
    %c0_i32_0 = arith.constant 0 : i32
    return %arg0, %arg1, %c0_i32 : i32, i32, i32
  }
  func.func @transform_1(%arg0: i32, %arg1: i32) -> (i32, i32, i32) {
    %c0_i32 = arith.constant 0 : i32
    %c0_i32_0 = arith.constant 0 : i32
    return %arg0, %arg1, %c0_i32 : i32, i32, i32
  }
}

</mosaic_0001>

<bundles_post_ra>
// kernel: tpu_custom_call.1
= control target key start
LH: loop header
LB: loop body
LE: loop exit
PB: predicated region body
PF: predicated region fallthrough
CT: control target
= control target key end

     0   :  { %6 = vsyncpa [#allocation3], 0  ;;  %s3881_s0 = inlined_call_operand.hbm [shape: f32[35,64,128], index: 0, kind: input, shape index: {}]   ;;  %s3882_s1 = inlined_call_operand.hbm [shape: f32[35,64,128], index: 1, kind: output, shape index: {}]  }
   0x1   :  { %8 = vsyncpa [#allocation3 + $0x1], 0 }
   0x2   :  { %9 = vsyncpa [#allocation4], 0 }
   0x3   :  { %11 = vsyncpa [#allocation4 + $0x1], 0  ;;  %s2242_s6 = smov 0   ;;  %s2244_s7 = smov 0  }
   0x4   :  { %s2246_s8 = smov 0   ;;  %s2248_s9 = smov 0  }
   0x5   :  { %s2250_s10 = smov 0   ;;  %s2252_s11 = smov 0  }
   0x6 LB: > { %s1728_s12 = sadd.s32 4294967295, %s2223_s11   ;;  %s1729_s13 = sadd.s32 4294967294, %s2223_s11   ;;  %s2223_s11 = sphi %s2252_s11, %s17_s11   ;;  %s2219_s10 = sphi %s2250_s10, %s3893_s10   ;;  %s2215_s9 = sphi %s2248_s9, %s3892_s9   ;;  %s2211_s8 = sphi %s2246_s8, %s3891_s8   ;;  %s2207_s7 = sphi %s2244_s7, %s3890_s7   ;;  %s2203_s6 = sphi %s2242_s6, %s3889_s6  }
   0x7   : > { %s29_s14 = sadd.s32 1, %s2219_s10  ;;  %s38_s15 = sadd.s32 1, %s2211_s8 }
   0x8   : > { %p31_p0 = scmp.ge.s32.totalorder %s29_s14, 2  ;;  %p45_p1 = scmp.ne.s32.totalorder %s2211_s8, %s2207_s7 }
   0x9   : > { %p46_p2 = scmp.eq.s32.totalorder %s2223_s11, 0  ;;  %p51_p3 = scmp.ne.s32.totalorder %s2207_s7, %s2203_s6 }
   0xa   : > { %s3895_s14 = smov (%p31_p0, %s29_s14), 0  ;;  %p52_p5 = scmp.eq.s32.totalorder %s1728_s12, 0 }
   0xb   : > { %p47_p4 = por %p46_p2, %p45_p1  ;;  %s33_s16 = ssub.s32 %s2219_s10, %s3895_s14 }
   0xc   : > { %p77_p6 = scmp.eq.s32.totalorder %s1728_s12, 1  ;;  %p36_p7 = scmp.eq.s32.totalorder %s33_s16, 0 }
   0xd   : > { %p2285_p8 = por %p52_p5, %p51_p3  ;;  %p83_p10 = scmp.eq.s32.totalorder %s1729_s13, 1 }
   0xe   : > { %p2289_p9 = por %p77_p6, %p45_p1  ;;  %p3883_p12 = scmp.ge.s32.totalorder %s2223_s11, 2 }
   0xf   : > { %s2294_s19 = scalar_select %p36_p7, %s2211_s8, %s38_s15  }
  0x10   : > { %p2296_p11 = por %p83_p10, %p51_p3  ;;  %99 = sbr.rel (%p3883_p12) target bundleno = 58 (0x3a), region = 16 }
  0x12   : > { %s3886_s20 = scalar_select %p2296_p11, 1, 0 }
  0x17   : > { %102 = sbr.rel (!%p47_p4) target bundleno = 58 (0x3a), region = 20  ;;  %s103_s21 = sand.u32 (%p47_p4), 1, %s2211_s8  }
  0x18   : > { %s108_s22 = smul.u32 (%p47_p4), 18, %s2219_s10  ;;  %s2308_s27 = scalar_lea.sflag (%p47_p4), [#allocation3], %s103_s21 }
  0x19   : > { %s1763_s23 = smul.u32 (%p47_p4), 1152, %s103_s21 }
  0x1a   : > { %s110_s24 = ssub.s32 (%p47_p4), 35, %s108_s22 }
  0x1b   : > { %p111_p13 = scmp.lt.s32.totalorder (%p47_p4), %s110_s24, 18  ;;  %s107_s28 = scalar_lea.vmem (%p47_p4), [#allocation2], %s1763_s23 }
  0x1e   : > { %s3897_s24 = smov (!%p111_p13, %s110_s24), 18 }
  0x1f   : > { %s2305_s25 = sshll.u32 %s3897_s24, 10 }
  0x20   : > { %s116_s26 = ssub.s32 18432, %s2305_s25 }
  0x21   : > { %117 = vsyncadd %s2308_s27, %s116_s26  ;;  %p1734_p0 = scmp.ne.s32.totalorder %s2305_s25, 0  ;;  %s1761_s29 = smul.u32 18432, %s2219_s10 }
  0x22   : > { %s125_s30 = sshll.u32 %s107_s28, 4  ;;  %s2117_s15 = scalar_lea.hbm %s3881_s0, 35840  ;;  %s2318_s30 = int_to_ptr.vmem [resolvable:$true] %s125_s30 }
  0x23   : > { %s2316_s4 = scalar_lea.hbm %s3881_s0, %s1761_s29 }
  0x24   : > { %s2113_s5 = scalar_lea.hbm %s2316_s4, %s2305_s25  ;;  %p2118_p4 = scmp.lt.u32.totalorder %s2316_s4, %s3881_s0 }
  0x25   : > { %p2114_p1 = scmp.ne.s32.totalorder %s2316_s4, %s2113_s5  ;;  %p2119_p5 = scmp.lt.u32.totalorder %s2117_s15, %s2113_s5 }
  0x26   : > { %p2121_p7 = scmp.lt.u32.totalorder %s2113_s5, %s2316_s4 }
  0x27   : > { %p2115_p2 = pnand %p2114_p1, %p1734_p0  ;;  %p2120_p6 = por %p2119_p5, %p2118_p4 }
  0x29   : > { %p2116_p3 = pneg %p2115_p2  ;;  %p2122_p10 = por %p2121_p7, %p2120_p6 }
  0x2b   : > { %p2123_p13 = pnand %p2122_p10, %p2116_p3 }
  0x2d   : > { %2126 = shalt.err (!%p2123_p13)
}
  0x2e   : > { %s2127_s22 = scalar_lea.vmem %s2318_s30, %s2305_s25  ;;  %s2225_s23 = smov [#allocation2]  }
  0x2f   : > { %p2128_p1 = scmp.ne.s32.totalorder %s2318_s30, %s2127_s22  ;;  %s2131_s24 = sshll.u32 %s2225_s23, 4  ;;  %s2132_s24 = int_to_ptr.vmem [resolvable:$false] %s2131_s24 }
  0x30   : > { %s2133_s26 = scalar_lea.vmem %s2132_s24, 36864  ;;  %p2134_p11 = scmp.lt.s32.totalorder %s2318_s30, %s2132_s24 }
  0x31   : > { %p2129_p2 = pnand %p2128_p1, %p1734_p0  ;;  %p2135_p4 = scmp.lt.s32.totalorder %s2133_s26, %s2127_s22 }
  0x33   : > { %p2130_p12 = pneg %p2129_p2  ;;  %p2136_p5 = por %p2135_p4, %p2134_p11 }
  0x35   : > { %p2137_p6 = pnand %p2136_p5, %p2130_p12 }
  0x37   : > { %2140 = shalt.err (!%p2137_p6)
}
  0x38   : > { %s2226_s28 = smov 128   ;;  %s2227_s29 = smov 8  }
  0x39   : > { %131 = dma.hbm_to_vmem [thread:$0]  (%p1734_p0), %s2316_s4, %s2305_s25, %s2318_s30, %s2308_s27, %s2226_s28, %s2226_s28, %s2227_s29  }
  0x3a PF: > { %p1740_p3 = scmp.ge.s32.totalorder %s2223_s11, 1  ;;  %p133_p7 = scmp.lt.s32.totalorder %s2223_s11, 3 }
  0x3c   : > { %p134_p10 = pnand %p1740_p3, %p133_p7 }
  0x3d   : > { %s2348_s2 = sand.u32 (!%p134_p10), 1, %s2207_s7  }
  0x3e   : > { %137 = sbr.rel (%p134_p10) target bundleno = 399 (0x18f), region = 24  ;;  %s140_s5 = scalar_lea.sflag (!%p134_p10), [#allocation3], %s2348_s2 }
  0x3f   : > { %s1764_s3 = smul.u32 (!%p134_p10), 1152, %s2348_s2 }
  0x41   : > { %s2354_s12 = scalar_lea.vmem (!%p134_p10), [#allocation2], %s1764_s3 }
  0x45   : > { %2194 = dma.done.wait (%p2285_p8), %s140_s5, 18432  }
  0x46   : > { %2196 = vsyncadd (%p2285_p8), %s140_s5, 4294948864  ;;  %v2361_v0 = vld [vmem:[%s2354_s12] sm:$0xff]  ;;  %v2364_v1 = vld [vmem:[%s2354_s12 + $0x8] sm:$0xff]  ;;  %v2228_v5 = vmov 0.25   ;;  %s2500_s17 = scalar_lea.vmem [#allocation5], %s1764_s3  ;;  %s1617_s25 = scalar_lea.sflag [#allocation4], %s2348_s2 }
  0x47   : > { %v2367_v2 = vld [vmem:[%s2354_s12 + $0x10] sm:$0xff]  ;;  %v320_v3 = vmul.f32 0.70710677, %v2361_v0  ;;  %vm752_vm0 = vcmp.lt.f32.partialorder %v2361_v0, 0.0  ;;  %v321_v4 = vmul.f32 0.70710677, %v2364_v1 }
  0x48   : > { %vm753_vm1 = vcmp.lt.f32.partialorder %v2364_v1, 0.0  ;;  %v2374_v6 = vsel %vm752_vm0, -5.0, %v2228_v5  ;;  %v322_v8 = vmul.f32 0.70710677, %v2367_v2  ;;  %vm754_vm2 = vcmp.lt.f32.partialorder %v2367_v2, 0.0  ;;  %v2382_v9 = vld [vmem:[%s2354_s12 + $0x18] sm:$0xff] }
  0x49   : > { %v2377_v7 = vsel %vm753_vm1, -5.0, %v2228_v5  ;;  %1825 = verf.f32 %v320_v3  ;;  %v2385_v10 = vsel %vm754_vm2, -5.0, %v2228_v5  ;;  %v323_v11 = vmul.f32 0.70710677, %v2382_v9  ;;  %v2390_v12 = vld [vmem:[%s2354_s12 + $0x20] sm:$0xff]  ;;  %v2393_v13 = vld [vmem:[%s2354_s12 + $0x28] sm:$0xff] }
  0x4a   : > { %vm755_vm3 = vcmp.lt.f32.partialorder %v2382_v9, 0.0  ;;  %1827 = verf.f32 %v321_v4  ;;  %v324_v15 = vmul.f32 0.70710677, %v2390_v12  ;;  %vm756_vm4 = vcmp.lt.f32.partialorder %v2390_v12, 0.0  ;;  %v2401_v16 = vld [vmem:[%s2354_s12 + $0x30] sm:$0xff]  ;;  %v2404_v17 = vld [vmem:[%s2354_s12 + $0x38] sm:$0xff] }
  0x4b   : > { %v2396_v14 = vsel %vm755_vm3, -5.0, %v2228_v5  ;;  %1829 = verf.f32 %v322_v8  ;;  %v2407_v18 = vsel %vm756_vm4, -5.0, %v2228_v5  ;;  %v325_v19 = vmul.f32 0.70710677, %v2393_v13  ;;  %v2412_v20 = vld [vmem:[%s2354_s12 + $0x40] sm:$0xff]  ;;  %v2420_v23 = vld [vmem:[%s2354_s12 + $0x48] sm:$0xff] }
  0x4c   : > { %vm757_vm5 = vcmp.lt.f32.partialorder %v2393_v13, 0.0  ;;  %1831 = verf.f32 %v323_v11  ;;  %v326_v22 = vmul.f32 0.70710677, %v2401_v16  ;;  %vm758_vm6 = vcmp.lt.f32.partialorder %v2401_v16, 0.0  ;;  %v2428_v26 = vld [vmem:[%s2354_s12 + $0x50] sm:$0xff]  ;;  %v2436_v29 = vld [vmem:[%s2354_s12 + $0x58] sm:$0xff] }
  0x4d   : > { %v2415_v21 = vsel %vm757_vm5, -5.0, %v2228_v5  ;;  %1833 = verf.f32 %v324_v15  ;;  %v2423_v24 = vsel %vm758_vm6, -5.0, %v2228_v5  ;;  %v327_v25 = vmul.f32 0.70710677, %v2404_v17  ;;  %v2444_v32 = vld [vmem:[%s2354_s12 + $0x60] sm:$0xff]  ;;  %v2452_v35 = vld [vmem:[%s2354_s12 + $0x68] sm:$0xff] }
  0x4e   : > { %vm759_vm7 = vcmp.lt.f32.partialorder %v2404_v17, 0.0  ;;  %1835 = verf.f32 %v325_v19  ;;  %v328_v28 = vmul.f32 0.70710677, %v2412_v20  ;;  %vm760_vm8 = vcmp.lt.f32.partialorder %v2412_v20, 0.0  ;;  %v2460_v38 = vld [vmem:[%s2354_s12 + $0x70] sm:$0xff]  ;;  %v2468_v41 = vld [vmem:[%s2354_s12 + $0x78] sm:$0xff] }
  0x4f   : > { %v2431_v27 = vsel %vm759_vm7, -5.0, %v2228_v5  ;;  %1837 = verf.f32 %v326_v22  ;;  %v2439_v30 = vsel %vm760_vm8, -5.0, %v2228_v5  ;;  %v329_v31 = vmul.f32 0.70710677, %v2420_v23  ;;  %s1624_s27 = smul.u32 (%p2289_p9), 18, %s2215_s9 }
  0x50   : > { %vm761_vm9 = vcmp.lt.f32.partialorder %v2420_v23, 0.0  ;;  %1839 = verf.f32 %v327_v25  ;;  %v330_v34 = vmul.f32 0.70710677, %v2428_v26  ;;  %vm762_vm10 = vcmp.lt.f32.partialorder %v2428_v26, 0.0 }
  0x51   : > { %v2447_v33 = vsel %vm761_vm9, -5.0, %v2228_v5  ;;  %1841 = verf.f32 %v328_v28  ;;  %v2455_v36 = vsel %vm762_vm10, -5.0, %v2228_v5  ;;  %v331_v37 = vmul.f32 0.70710677, %v2436_v29  ;;  %s1626_s30 = ssub.s32 (%p2289_p9), 35, %s1624_s27 }
  0x52   : > { %vm763_vm11 = vcmp.lt.f32.partialorder %v2436_v29, 0.0  ;;  %1843 = verf.f32 %v329_v31  ;;  %v332_v40 = vmul.f32 0.70710677, %v2444_v32  ;;  %vm764_vm12 = vcmp.lt.f32.partialorder %v2444_v32, 0.0  ;;  %p1627_p8 = scmp.lt.s32.totalorder (%p2289_p9), %s1626_s30, 18 }
  0x53   : > { %v2463_v39 = vsel %vm763_vm11, -5.0, %v2228_v5  ;;  %v1826_v42 = vpop.eup %1825  ;;  %1845 = verf.f32 %v330_v34  ;;  %v2471_v43 = vsel %vm764_vm12, -5.0, %v2228_v5  ;;  %v333_v44 = vmul.f32 0.70710677, %v2452_v35 }
  0x54   : > { %vm765_vm13 = vcmp.lt.f32.partialorder %v2452_v35, 0.0  ;;  %v1828_v45 = vpop.eup %1827  ;;  %v608_v46 = vadd.f32 1.0, %v1826_v42  ;;  %1847 = verf.f32 %v331_v37  ;;  %v334_v48 = vmul.f32 0.70710677, %v2460_v38 }
  0x55   : > { %v2476_v47 = vsel %vm765_vm13, -5.0, %v2228_v5  ;;  %v1830_v49 = vpop.eup %1829  ;;  %v609_v50 = vadd.f32 1.0, %v1828_v45  ;;  %1849 = verf.f32 %v332_v40  ;;  %vm766_vm14 = vcmp.lt.f32.partialorder %v2460_v38, 0.0 }
  0x56   : > { %v335_v51 = vmul.f32 0.70710677, %v2468_v41  ;;  %v1832_v52 = vpop.eup %1831  ;;  %v1040_v53 = vmul.f32 %v608_v46, %v2361_v0  ;;  %v610_v54 = vadd.f32 1.0, %v1830_v49  ;;  %1851 = verf.f32 %v333_v44 }
  0x57   : > { %v2483_v55 = vsel %vm766_vm14, -5.0, %v2228_v5  ;;  %v1834_v56 = vpop.eup %1833  ;;  %v1041_v57 = vmul.f32 %v609_v50, %v2364_v1  ;;  %v611_v58 = vadd.f32 1.0, %v1832_v52  ;;  %1853 = verf.f32 %v334_v48 }
  0x58   : > { %vm767_vm15 = vcmp.lt.f32.partialorder %v2468_v41, 0.0  ;;  %v1836_v59 = vpop.eup %1835  ;;  %v1184_v60 = vmul.f32 %v1040_v53, %v2374_v6  ;;  %v1042_v61 = vmul.f32 %v610_v54, %v2367_v2  ;;  %v612_v62 = vadd.f32 1.0, %v1834_v56 }
  0x59   : > { %1855 = verf.f32 %v335_v51  ;;  %v1838_v63 = vpop.eup %1837  ;;  %v1185_v0 = vmul.f32 %v1041_v57, %v2377_v7  ;;  %v1043_v3 = vmul.f32 %v611_v58, %v2382_v9  ;;  %v613_v4 = vadd.f32 1.0, %v1836_v59  ;;  %v2521_v58 = vld [vmem:[%s2354_s12 + $0x80] sm:$0xff] }
  0x5a   : > { %v2492_v1 = vsel %vm767_vm15, -5.0, %v2228_v5  ;;  %v1840_v8 = vpop.eup %1839  ;;  %v1328_v11 = vmul.f32 %v1184_v60, %v1040_v53  ;;  %v1186_v15 = vmul.f32 %v1042_v61, %v2385_v10  ;;  %v1044_v6 = vmul.f32 %v612_v62, %v2390_v12 }
  0x5b   : > { %v614_v19 = vadd.f32 1.0, %v1838_v63  ;;  %v1842_v2 = vpop.eup %1841  ;;  %v1329_v22 = vmul.f32 %v1185_v0, %v1041_v57  ;;  %v1187_v25 = vmul.f32 %v1043_v3, %v2396_v14  ;;  %v1045_v28 = vmul.f32 %v613_v4, %v2393_v13  ;;  %v2534_v4 = vld [vmem:[%s2354_s12 + $0x88] sm:$0xff] }
  0x5c   : > { %v615_v7 = vadd.f32 1.0, %v1840_v8  ;;  %v1844_v31 = vpop.eup %1843  ;;  %1472 = vst [vmem:[%s2500_s17] sm:$0xff] %v1328_v11  ;;  %v1330_v9 = vmul.f32 %v1186_v15, %v1042_v61  ;;  %v1188_v10 = vmul.f32 %v1044_v6, %v2407_v18  ;;  %v616_v34 = vadd.f32 1.0, %v1842_v2  ;;  %v2540_v11 = vld [vmem:[%s2354_s12 + $0x90] sm:$0xff] }
  0x5d   : > { %v1046_v12 = vmul.f32 %v614_v19, %v2401_v16  ;;  %v1846_v37 = vpop.eup %1845  ;;  %1473 = vst [vmem:[%s2500_s17 + $0x8] sm:$0xff] %v1329_v22  ;;  %v1331_v14 = vmul.f32 %v1187_v25, %v1043_v3  ;;  %v1189_v13 = vmul.f32 %v1045_v28, %v2415_v21  ;;  %v617_v42 = vadd.f32 1.0, %v1844_v31  ;;  %v2552_v19 = vld [vmem:[%s2354_s12 + $0xa0] sm:$0xff]  ;;  %v2559_v22 = vld [vmem:[%s2354_s12 + $0xa8] sm:$0xff] }
  0x5e   : > { %v1047_v40 = vmul.f32 %v615_v7, %v2404_v17  ;;  %v1848_v44 = vpop.eup %1847  ;;  %1474 = vst [vmem:[%s2500_s17 + $0x10] sm:$0xff] %v1330_v9  ;;  %v1332_v45 = vmul.f32 %v1188_v10, %v1044_v6  ;;  %v1048_v18 = vmul.f32 %v616_v34, %v2412_v20  ;;  %v618_v48 = vadd.f32 1.0, %v1846_v37  ;;  %v2565_v7 = vld [vmem:[%s2354_s12 + $0xb0] sm:$0xff]  ;;  %v2572_v9 = vld [vmem:[%s2354_s12 + $0xb8] sm:$0xff]  ;;  %v2587_v37 = vld [vmem:[%s2354_s12 + $0xc0] sm:$0xff] }
  0x5f   : > { %v1190_v46 = vmul.f32 %v1046_v12, %v2423_v24  ;;  %v1850_v16 = vpop.eup %1849  ;;  %1475 = vst [vmem:[%s2500_s17 + $0x18] sm:$0xff] %v1331_v14  ;;  %v1333_v49 = vmul.f32 %v1189_v13, %v1045_v28  ;;  %v1049_v21 = vmul.f32 %v617_v42, %v2420_v23  ;;  %v619_v17 = vadd.f32 1.0, %v1848_v44  ;;  %v2593_v13 = vld [vmem:[%s2354_s12 + $0xc8] sm:$0xff] }
  0x60   : > { %v1191_v50 = vmul.f32 %v1047_v40, %v2431_v27  ;;  %v1852_v51 = vpop.eup %1851  ;;  %1476 = vst [vmem:[%s2500_s17 + $0x20] sm:$0xff] %v1332_v45  ;;  %v1192_v53 = vmul.f32 %v1048_v18, %v2439_v30  ;;  %v1050_v24 = vmul.f32 %v618_v48, %v2428_v26  ;;  %v620_v20 = vadd.f32 1.0, %v1850_v16  ;;  %v2603_v45 = vld [vmem:[%s2354_s12 + $0xd0] sm:$0xff] }
  0x61   : > { %v1334_v52 = vmul.f32 %v1190_v46, %v1046_v12  ;;  %v1854_v54 = vpop.eup %1853  ;;  %1477 = vst [vmem:[%s2500_s17 + $0x28] sm:$0xff] %v1333_v49  ;;  %v1193_v57 = vmul.f32 %v1049_v21, %v2447_v33  ;;  %v1051_v27 = vmul.f32 %v619_v17, %v2436_v29  ;;  %v621_v23 = vadd.f32 1.0, %v1852_v51  ;;  %v2616_v49 = vld [vmem:[%s2354_s12 + $0xd8] sm:$0xff] }
  0x62   : > { %v1335_v56 = vmul.f32 %v1191_v50, %v1047_v40  ;;  %v1336_v30 = vmul.f32 %v1192_v53, %v1048_v18  ;;  %v1194_v60 = vmul.f32 %v1050_v24, %v2455_v36  ;;  %v1052_v26 = vmul.f32 %v620_v20, %v2444_v32  ;;  %v2619_v50 = vld [vmem:[%s2354_s12 + $0xe0] sm:$0xff] }
  0x63   : > { %v1856_v59 = vpop.eup %1855  ;;  %1478 = vst [vmem:[%s2500_s17 + $0x30] sm:$0xff] %v1334_v52  ;;  %v622_v61 = vadd.f32 1.0, %v1854_v54  ;;  %v1337_v62 = vmul.f32 %v1193_v57, %v1049_v21  ;;  %v1195_v33 = vmul.f32 %v1051_v27, %v2463_v39  ;;  %v1053_v29 = vmul.f32 %v621_v23, %v2452_v35  ;;  %v2627_v52 = vld [vmem:[%s2354_s12 + $0xe8] sm:$0xff] }
  0x64   : > { %1479 = vst [vmem:[%s2500_s17 + $0x38] sm:$0xff] %v1335_v56  ;;  %v623_v63 = vadd.f32 1.0, %v1856_v59  ;;  %1480 = vst [vmem:[%s2500_s17 + $0x40] sm:$0xff] %v1336_v30  ;;  %v1338_v0 = vmul.f32 %v1194_v60, %v1050_v24  ;;  %v1196_v3 = vmul.f32 %v1052_v26, %v2471_v43  ;;  %v336_v32 = vmul.f32 0.70710677, %v2521_v58  ;;  %v2546_v43 = vld [vmem:[%s2354_s12 + $0x98] sm:$0xff] }
  0x65   : > { %v1054_v36 = vmul.f32 %v622_v61, %v2460_v38  ;;  %1481 = vst [vmem:[%s2500_s17 + $0x48] sm:$0xff] %v1337_v62  ;;  %v1339_v8 = vmul.f32 %v1195_v33, %v1051_v27  ;;  %v1197_v39 = vmul.f32 %v1053_v29, %v2476_v47  ;;  %vm768_vm0 = vcmp.lt.f32.partialorder %v2521_v58, 0.0  ;;  %v2643_v59 = vld [vmem:[%s2354_s12 + $0xf0] sm:$0xff] }
  0x66   : > { %v1055_v35 = vmul.f32 %v623_v63, %v2468_v41  ;;  %1482 = vst [vmem:[%s2500_s17 + $0x50] sm:$0xff] %v1338_v0  ;;  %v1340_v15 = vmul.f32 %v1196_v3, %v1052_v26  ;;  %1857 = verf.f32 %v336_v32  ;;  %v337_v41 = vmul.f32 0.70710677, %v2534_v4 }
  0x67   : > { %v1198_v38 = vmul.f32 %v1054_v36, %v2483_v55  ;;  %1483 = vst [vmem:[%s2500_s17 + $0x58] sm:$0xff] %v1339_v8  ;;  %v1341_v6 = vmul.f32 %v1197_v39, %v1053_v29  ;;  %vm769_vm1 = vcmp.lt.f32.partialorder %v2534_v4, 0.0  ;;  %v338_v55 = vmul.f32 0.70710677, %v2540_v11 }
  0x68   : > { %v1199_v47 = vmul.f32 %v1055_v35, %v2492_v1  ;;  %1484 = vst [vmem:[%s2500_s17 + $0x60] sm:$0xff] %v1340_v15  ;;  %vm770_vm2 = vcmp.lt.f32.partialorder %v2540_v11, 0.0  ;;  %v912_v1 = vsel %vm768_vm0, -5.0, %v2228_v5  ;;  %1859 = verf.f32 %v337_v41 }
  0x69   : > { %v1342_v2 = vmul.f32 %v1198_v38, %v1054_v36  ;;  %1485 = vst [vmem:[%s2500_s17 + $0x68] sm:$0xff] %v1341_v6  ;;  %v339_v28 = vmul.f32 0.70710677, %v2546_v43  ;;  %1861 = verf.f32 %v338_v55  ;;  %vm771_vm3 = vcmp.lt.f32.partialorder %v2546_v43, 0.0 }
  0x6a   : > { %v1343_v25 = vmul.f32 %v1199_v47, %v1055_v35  ;;  %v340_v31 = vmul.f32 0.70710677, %v2552_v19  ;;  %vm772_vm4 = vcmp.lt.f32.partialorder %v2552_v19, 0.0  ;;  %v2578_v10 = vsel %vm769_vm1, -5.0, %v2228_v5 }
  0x6b   : > { %1486 = vst [vmem:[%s2500_s17 + $0x70] sm:$0xff] %v1342_v2  ;;  %v2583_v12 = vsel %vm770_vm2, -5.0, %v2228_v5  ;;  %1863 = verf.f32 %v339_v28  ;;  %v341_v34 = vmul.f32 0.70710677, %v2559_v22  ;;  %vm773_vm5 = vcmp.lt.f32.partialorder %v2559_v22, 0.0 }
  0x6c   : > { %1487 = vst [vmem:[%s2500_s17 + $0x78] sm:$0xff] %v1343_v25  ;;  %1865 = verf.f32 %v340_v31  ;;  %v342_v14 = vmul.f32 0.70710677, %v2565_v7  ;;  %vm774_vm6 = vcmp.lt.f32.partialorder %v2565_v7, 0.0  ;;  %v2596_v40 = vsel %vm771_vm3, -5.0, %v2228_v5 }
  0x6d   : > { %v2599_v42 = vsel %vm772_vm4, -5.0, %v2228_v5  ;;  %1867 = verf.f32 %v341_v34  ;;  %v343_v44 = vmul.f32 0.70710677, %v2572_v9  ;;  %vm775_vm7 = vcmp.lt.f32.partialorder %v2572_v9, 0.0 }
  0x6e   : > { %1869 = verf.f32 %v342_v14  ;;  %v344_v46 = vmul.f32 0.70710677, %v2587_v37  ;;  %vm776_vm8 = vcmp.lt.f32.partialorder %v2587_v37, 0.0  ;;  %v2609_v18 = vsel %vm773_vm5, -5.0, %v2228_v5 }
  0x6f   : > { %v2612_v48 = vsel %vm774_vm6, -5.0, %v2228_v5  ;;  %1871 = verf.f32 %v343_v44  ;;  %v345_v16 = vmul.f32 0.70710677, %v2593_v13  ;;  %v2622_v17 = vsel %vm775_vm7, -5.0, %v2228_v5 }
  0x70   : > { %v1858_v21 = vpop.eup %1857  ;;  %1873 = verf.f32 %v344_v46  ;;  %vm777_vm9 = vcmp.lt.f32.partialorder %v2593_v13, 0.0  ;;  %v346_v51 = vmul.f32 0.70710677, %v2603_v45  ;;  %v2630_v24 = vsel %vm776_vm8, -5.0, %v2228_v5 }
  0x71   : > { %v624_v53 = vadd.f32 1.0, %v1858_v21  ;;  %1875 = verf.f32 %v345_v16  ;;  %vm778_vm10 = vcmp.lt.f32.partialorder %v2603_v45, 0.0  ;;  %v347_v20 = vmul.f32 0.70710677, %v2616_v49 }
  0x72   : > { %1877 = verf.f32 %v346_v51  ;;  %vm779_vm11 = vcmp.lt.f32.partialorder %v2616_v49, 0.0  ;;  %v348_v54 = vmul.f32 0.70710677, %v2619_v50  ;;  %v1860_v56 = vpop.eup %1859  ;;  %v2638_v27 = vsel %vm777_vm9, -5.0, %v2228_v5 }
  0x73   : > { %v1056_v57 = vmul.f32 %v624_v53, %v2521_v58  ;;  %vm780_vm12 = vcmp.lt.f32.partialorder %v2619_v50, 0.0  ;;  %v349_v23 = vmul.f32 0.70710677, %v2627_v52  ;;  %v1862_v30 = vpop.eup %1861  ;;  %v625_v60 = vadd.f32 1.0, %v1860_v56 }
  0x74   : > { %v2646_v26 = vsel %vm778_vm10, -5.0, %v2228_v5  ;;  %1879 = verf.f32 %v347_v20  ;;  %v2649_v61 = vsel %vm779_vm11, -5.0, %v2228_v5  ;;  %v626_v33 = vadd.f32 1.0, %v1862_v30  ;;  %v2685_v30 = vld [vmem:[%s2354_s12 + $0x100] sm:$0xff] }
  0x75   : > { %v1864_v62 = vpop.eup %1863  ;;  %v1200_v58 = vmul.f32 %v1056_v57, %v912_v1  ;;  %1881 = verf.f32 %v348_v54  ;;  %v2652_v29 = vsel %vm780_vm12, -5.0, %v2228_v5  ;;  %v1057_v0 = vmul.f32 %v625_v60, %v2534_v4 }
  0x76   : > { %v1866_v63 = vpop.eup %1865  ;;  %v627_v3 = vadd.f32 1.0, %v1864_v62  ;;  %1883 = verf.f32 %v349_v23  ;;  %v350_v36 = vmul.f32 0.70710677, %v2643_v59  ;;  %v1058_v39 = vmul.f32 %v626_v33, %v2540_v11 }
  0x77   : > { %v1868_v32 = vpop.eup %1867  ;;  %v1344_v8 = vmul.f32 %v1200_v58, %v1056_v57  ;;  %v628_v35 = vadd.f32 1.0, %v1866_v63  ;;  %vm781_vm13 = vcmp.lt.f32.partialorder %v2627_v52, 0.0  ;;  %v1201_v38 = vmul.f32 %v1057_v0, %v2578_v10 }
  0x78   : > { %v1870_v15 = vpop.eup %1869  ;;  %v1059_v6 = vmul.f32 %v627_v3, %v2546_v43  ;;  %v629_v47 = vadd.f32 1.0, %v1868_v32  ;;  %1885 = verf.f32 %v350_v36  ;;  %v1202_v4 = vmul.f32 %v1058_v39, %v2583_v12 }
  0x79   : > { %v1872_v41 = vpop.eup %1871  ;;  %1488 = vst [vmem:[%s2500_s17 + $0x80] sm:$0xff] %v1344_v8  ;;  %v1060_v2 = vmul.f32 %v628_v35, %v2552_v19  ;;  %v630_v55 = vadd.f32 1.0, %v1870_v15  ;;  %vm782_vm14 = vcmp.lt.f32.partialorder %v2643_v59, 0.0  ;;  %v1345_v25 = vmul.f32 %v1201_v38, %v1057_v0  ;;  %v2669_v19 = vld [vmem:[%s2354_s12 + $0xf8] sm:$0xff]  ;;  %v2705_v35 = vld [vmem:[%s2354_s12 + $0x110] sm:$0xff] }
  0x7a   : > { %v1874_v11 = vpop.eup %1873  ;;  %v1203_v1 = vmul.f32 %v1059_v6, %v2596_v40  ;;  %v1061_v43 = vmul.f32 %v629_v47, %v2559_v22  ;;  %v631_v28 = vadd.f32 1.0, %v1872_v41  ;;  %v1346_v10 = vmul.f32 %v1202_v4, %v1058_v39  ;;  %v2702_v39 = vld [vmem:[%s2354_s12 + $0x108] sm:$0xff]  ;;  %v2723_v4 = vld [vmem:[%s2354_s12 + $0x120] sm:$0xff] }
  0x7b   : > { %v1876_v31 = vpop.eup %1875  ;;  %v1204_v34 = vmul.f32 %v1060_v2, %v2599_v42  ;;  %v1062_v12 = vmul.f32 %v630_v55, %v2565_v7  ;;  %v632_v14 = vadd.f32 1.0, %v1874_v11  ;;  %1489 = vst [vmem:[%s2500_s17 + $0x88] sm:$0xff] %v1345_v25  ;;  %v352_v36 = vmul.f32 0.70710677, %v2685_v30  ;;  %v2731_v11 = vld [vmem:[%s2354_s12 + $0x128] sm:$0xff] }
  0x7c   : > { %v1878_v44 = vpop.eup %1877  ;;  %v1347_v46 = vmul.f32 %v1203_v1, %v1059_v6  ;;  %v1205_v16 = vmul.f32 %v1061_v43, %v2609_v18  ;;  %v1063_v40 = vmul.f32 %v631_v28, %v2572_v9  ;;  %v633_v22 = vadd.f32 1.0, %v1876_v31  ;;  %1490 = vst [vmem:[%s2500_s17 + $0x90] sm:$0xff] %v1346_v10  ;;  %v2717_v6 = vld [vmem:[%s2354_s12 + $0x118] sm:$0xff]  ;;  %v2745_v10 = vld [vmem:[%s2354_s12 + $0x130] sm:$0xff] }
  0x7d   : > { %v1348_v21 = vmul.f32 %v1204_v34, %v1060_v2  ;;  %v1206_v42 = vmul.f32 %v1062_v12, %v2612_v48  ;;  %v1064_v51 = vmul.f32 %v632_v14, %v2587_v37  ;;  %v634_v7 = vadd.f32 1.0, %v1878_v44  ;;  %v2748_v34 = vld [vmem:[%s2354_s12 + $0x138] sm:$0xff] }
  0x7e   : > { %v1880_v53 = vpop.eup %1879  ;;  %1491 = vst [vmem:[%s2500_s17 + $0x98] sm:$0xff] %v1347_v46  ;;  %v1349_v20 = vmul.f32 %v1205_v16, %v1061_v43  ;;  %v1207_v54 = vmul.f32 %v1063_v40, %v2622_v17  ;;  %v1065_v18 = vmul.f32 %v633_v22, %v2593_v13  ;;  %v351_v9 = vmul.f32 0.70710677, %v2669_v19  ;;  %v2756_v46 = vld [vmem:[%s2354_s12 + $0x140] sm:$0xff]  ;;  %v2766_v22 = vld [vmem:[%s2354_s12 + $0x148] sm:$0xff] }
  0x7f   : > { %v1882_v56 = vpop.eup %1881  ;;  %1492 = vst [vmem:[%s2500_s17 + $0xa0] sm:$0xff] %v1348_v21  ;;  %v1350_v57 = vmul.f32 %v1206_v42, %v1062_v12  ;;  %v1208_v23 = vmul.f32 %v1064_v51, %v2630_v24  ;;  %v1066_v37 = vmul.f32 %v634_v7, %v2603_v45  ;;  %v635_v48 = vadd.f32 1.0, %v1880_v53 }
  0x80   : > { %v1884_v60 = vpop.eup %1883  ;;  %1493 = vst [vmem:[%s2500_s17 + $0xa8] sm:$0xff] %v1349_v20  ;;  %v1351_v17 = vmul.f32 %v1207_v54, %v1063_v40  ;;  %v1209_v62 = vmul.f32 %v1065_v18, %v2638_v27  ;;  %v636_v13 = vadd.f32 1.0, %v1882_v56  ;;  %1887 = verf.f32 %v351_v9  ;;  %v2778_v20 = vld [vmem:[%s2354_s12 + $0x150] sm:$0xff] }
  0x81   : > { %1494 = vst [vmem:[%s2500_s17 + $0xb0] sm:$0xff] %v1350_v57  ;;  %v1352_v58 = vmul.f32 %v1208_v23, %v1064_v51  ;;  %v1210_v24 = vmul.f32 %v1066_v37, %v2646_v26  ;;  %v1067_v45 = vmul.f32 %v635_v48, %v2616_v49  ;;  %v637_v33 = vadd.f32 1.0, %v1884_v60  ;;  %v2789_v23 = vld [vmem:[%s2354_s12 + $0x158] sm:$0xff]  ;;  %v2797_v60 = vld [vmem:[%s2354_s12 + $0x160] sm:$0xff] }
  0x82   : > { %v1886_v63 = vpop.eup %1885  ;;  %1495 = vst [vmem:[%s2500_s17 + $0xb8] sm:$0xff] %v1351_v17  ;;  %v1353_v0 = vmul.f32 %v1209_v62, %v1065_v18  ;;  %v1068_v3 = vmul.f32 %v636_v13, %v2619_v50  ;;  %v925_v27 = vsel %vm781_vm13, -5.0, %v2228_v5  ;;  %v926_v15 = vsel %vm782_vm14, -5.0, %v2228_v5 }
  0x83   : > { %1496 = vst [vmem:[%s2500_s17 + $0xc0] sm:$0xff] %v1352_v58  ;;  %v1354_v32 = vmul.f32 %v1210_v24, %v1066_v37  ;;  %v1211_v26 = vmul.f32 %v1067_v45, %v2649_v61  ;;  %v1069_v49 = vmul.f32 %v637_v33, %v2627_v52  ;;  %v638_v8 = vadd.f32 1.0, %v1886_v63  ;;  %v2804_v58 = vld [vmem:[%s2354_s12 + $0x168] sm:$0xff] }
  0x84   : > { %1497 = vst [vmem:[%s2500_s17 + $0xc8] sm:$0xff] %v1353_v0  ;;  %v1212_v50 = vmul.f32 %v1068_v3, %v2652_v29  ;;  %vm783_vm15 = vcmp.lt.f32.partialorder %v2669_v19, 0.0  ;;  %1889 = verf.f32 %v352_v36  ;;  %vm784_vm0 = vcmp.lt.f32.partialorder %v2685_v30, 0.0 }
  0x85   : > { %1498 = vst [vmem:[%s2500_s17 + $0xd0] sm:$0xff] %v1354_v32  ;;  %v1355_v52 = vmul.f32 %v1211_v26, %v1067_v45  ;;  %v1213_v61 = vmul.f32 %v1069_v49, %v925_v27  ;;  %v1070_v38 = vmul.f32 %v638_v8, %v2643_v59  ;;  %v353_v29 = vmul.f32 0.70710677, %v2702_v39 }
  0x86   : > { %v1356_v47 = vmul.f32 %v1212_v50, %v1068_v3  ;;  %vm785_vm1 = vcmp.lt.f32.partialorder %v2702_v39, 0.0  ;;  %v354_v41 = vmul.f32 0.70710677, %v2705_v35  ;;  %v927_v59 = vsel %vm783_vm15, -5.0, %v2228_v5 }
  0x87   : > { %1499 = vst [vmem:[%s2500_s17 + $0xd8] sm:$0xff] %v1355_v52  ;;  %v1357_v2 = vmul.f32 %v1213_v61, %v1069_v49  ;;  %v1214_v55 = vmul.f32 %v1070_v38, %v926_v15  ;;  %vm786_vm2 = vcmp.lt.f32.partialorder %v2705_v35, 0.0  ;;  %v928_v25 = vsel %vm784_vm0, -5.0, %v2228_v5  ;;  %v2818_v15 = vld [vmem:[%s2354_s12 + $0x170] sm:$0xff] }
  0x88   : > { %1500 = vst [vmem:[%s2500_s17 + $0xe0] sm:$0xff] %v1356_v47  ;;  %1891 = verf.f32 %v353_v29  ;;  %v355_v1 = vmul.f32 0.70710677, %v2717_v6  ;;  %vm787_vm3 = vcmp.lt.f32.partialorder %v2717_v6, 0.0  ;;  %v2741_v28 = vsel %vm785_vm1, -5.0, %v2228_v5 }
  0x89   : > { %1501 = vst [vmem:[%s2500_s17 + $0xe8] sm:$0xff] %v1357_v2  ;;  %v1358_v43 = vmul.f32 %v1214_v55, %v1070_v38  ;;  %1893 = verf.f32 %v354_v41  ;;  %v356_v31 = vmul.f32 0.70710677, %v2723_v4  ;;  %v2751_v14 = vsel %vm786_vm2, -5.0, %v2228_v5 }
  0x8a   : > { %v1888_v12 = vpop.eup %1887  ;;  %1895 = verf.f32 %v355_v1  ;;  %vm788_vm4 = vcmp.lt.f32.partialorder %v2723_v4, 0.0  ;;  %v357_v44 = vmul.f32 0.70710677, %v2731_v11  ;;  %v2762_v40 = vsel %vm787_vm3, -5.0, %v2228_v5 }
  0x8b   : > { %1502 = vst [vmem:[%s2500_s17 + $0xf0] sm:$0xff] %v1358_v43  ;;  %v639_v16 = vadd.f32 1.0, %v1888_v12  ;;  %1897 = verf.f32 %v356_v31  ;;  %vm789_vm5 = vcmp.lt.f32.partialorder %v2731_v11, 0.0  ;;  %v358_v21 = vmul.f32 0.70710677, %v2745_v10 }
  0x8c   : > { %1899 = verf.f32 %v357_v44  ;;  %vm790_vm6 = vcmp.lt.f32.partialorder %v2745_v10, 0.0  ;;  %v359_v42 = vmul.f32 0.70710677, %v2748_v34  ;;  %v2773_v7 = vsel %vm788_vm4, -5.0, %v2228_v5 }
  0x8d   : > { %v1071_v51 = vmul.f32 %v639_v16, %v2669_v19  ;;  %vm791_vm7 = vcmp.lt.f32.partialorder %v2748_v34, 0.0  ;;  %v360_v53 = vmul.f32 0.70710677, %v2756_v46  ;;  %v2781_v18 = vsel %vm789_vm5, -5.0, %v2228_v5 }
  0x8e   : > { %v1890_v54 = vpop.eup %1889  ;;  %1901 = verf.f32 %v358_v21  ;;  %vm792_vm8 = vcmp.lt.f32.partialorder %v2756_v46, 0.0  ;;  %v361_v19 = vmul.f32 0.70710677, %v2766_v22  ;;  %v2786_v57 = vsel %vm790_vm6, -5.0, %v2228_v5 }
  0x8f   : > { %v1215_v9 = vmul.f32 %v1071_v51, %v927_v59  ;;  %v640_v56 = vadd.f32 1.0, %v1890_v54  ;;  %1903 = verf.f32 %v359_v42  ;;  %v2792_v37 = vsel %vm791_vm7, -5.0, %v2228_v5  ;;  %v2847_v54 = vld [vmem:[%s2354_s12 + $0x178] sm:$0xff] }
  0x90   : > { %1905 = verf.f32 %v360_v53  ;;  %vm793_vm9 = vcmp.lt.f32.partialorder %v2766_v22, 0.0  ;;  %v362_v48 = vmul.f32 0.70710677, %v2778_v20  ;;  %v2801_v13 = vsel %vm792_vm8, -5.0, %v2228_v5 }
  0x91   : > { %v1359_v17 = vmul.f32 %v1215_v9, %v1071_v51  ;;  %v1072_v62 = vmul.f32 %v640_v56, %v2685_v30  ;;  %1907 = verf.f32 %v361_v19  ;;  %v2807_v45 = vsel %vm793_vm9, -5.0, %v2228_v5 }
  0x92   : > { %v1892_v24 = vpop.eup %1891  ;;  %1909 = verf.f32 %v362_v48  ;;  %vm794_vm10 = vcmp.lt.f32.partialorder %v2778_v20, 0.0  ;;  %v363_v33 = vmul.f32 0.70710677, %v2789_v23  ;;  %vm795_vm11 = vcmp.lt.f32.partialorder %v2789_v23, 0.0 }
  0x93   : > { %v1894_v63 = vpop.eup %1893  ;;  %1503 = vst [vmem:[%s2500_s17 + $0xf8] sm:$0xff] %v1359_v17  ;;  %v1216_v0 = vmul.f32 %v1072_v62, %v928_v25  ;;  %v641_v30 = vadd.f32 1.0, %v1892_v24  ;;  %v364_v3 = vmul.f32 0.70710677, %v2797_v60  ;;  %vm796_vm12 = vcmp.lt.f32.partialorder %v2797_v60, 0.0 }
  0x94   : > { %v1896_v27 = vpop.eup %1895  ;;  %v642_v36 = vadd.f32 1.0, %v1894_v63  ;;  %1911 = verf.f32 %v363_v33  ;;  %v365_v32 = vmul.f32 0.70710677, %v2804_v58  ;;  %v938_v47 = vsel %vm794_vm10, -5.0, %v2228_v5 }
  0x95   : > { %v1898_v26 = vpop.eup %1897  ;;  %v1360_v49 = vmul.f32 %v1216_v0, %v1072_v62  ;;  %v1073_v8 = vmul.f32 %v641_v30, %v2702_v39  ;;  %v643_v50 = vadd.f32 1.0, %v1896_v27  ;;  %1913 = verf.f32 %v364_v3  ;;  %v2864_v30 = vld [vmem:[%s2354_s12 + $0x180] sm:$0xff] }
  0x96   : > { %v1900_v52 = vpop.eup %1899  ;;  %v1074_v61 = vmul.f32 %v642_v36, %v2705_v35  ;;  %v644_v38 = vadd.f32 1.0, %v1898_v26  ;;  %1915 = verf.f32 %v365_v32  ;;  %v2830_v39 = vsel %vm795_vm11, -5.0, %v2228_v5 }
  0x97   : > { %1504 = vst [vmem:[%s2500_s17 + $0x100] sm:$0xff] %v1360_v49  ;;  %v1217_v29 = vmul.f32 %v1073_v8, %v2741_v28  ;;  %v1075_v41 = vmul.f32 %v643_v50, %v2717_v6  ;;  %v645_v2 = vadd.f32 1.0, %v1900_v52  ;;  %v2837_v25 = vsel %vm796_vm12, -5.0, %v2228_v5  ;;  %v2870_v49 = vld [vmem:[%s2354_s12 + $0x188] sm:$0xff] }
  0x98   : > { %v1902_v55 = vpop.eup %1901  ;;  %v1218_v35 = vmul.f32 %v1074_v61, %v2751_v14  ;;  %v1076_v59 = vmul.f32 %v644_v38, %v2723_v4  ;;  %v366_v1 = vmul.f32 0.70710677, %v2818_v15  ;;  %vm797_vm13 = vcmp.lt.f32.partialorder %v2804_v58, 0.0  ;;  %v2882_v38 = vld [vmem:[%s2354_s12 + $0x190] sm:$0xff] }
  0x99   : > { %v1904_v6 = vpop.eup %1903  ;;  %v1361_v43 = vmul.f32 %v1217_v29, %v1073_v8  ;;  %v1219_v28 = vmul.f32 %v1075_v41, %v2762_v40  ;;  %v1077_v31 = vmul.f32 %v645_v2, %v2731_v11  ;;  %v646_v12 = vadd.f32 1.0, %v1902_v55  ;;  %v2893_v55 = vld [vmem:[%s2354_s12 + $0x198] sm:$0xff] }
  0x9a   : > { %v1906_v44 = vpop.eup %1905  ;;  %v1362_v14 = vmul.f32 %v1218_v35, %v1074_v61  ;;  %v1220_v4 = vmul.f32 %v1076_v59, %v2773_v7  ;;  %v647_v16 = vadd.f32 1.0, %v1904_v6  ;;  %1917 = verf.f32 %v366_v1 }
  0x9b   : > { %v1908_v21 = vpop.eup %1907  ;;  %1505 = vst [vmem:[%s2500_s17 + $0x108] sm:$0xff] %v1361_v43  ;;  %v1363_v42 = vmul.f32 %v1219_v28, %v1075_v41  ;;  %v1221_v51 = vmul.f32 %v1077_v31, %v2781_v18  ;;  %v1078_v53 = vmul.f32 %v646_v12, %v2745_v10  ;;  %v648_v40 = vadd.f32 1.0, %v1906_v44  ;;  %v2904_v43 = vld [vmem:[%s2354_s12 + $0x1a8] sm:$0xff] }
  0x9c   : > { %v1910_v11 = vpop.eup %1909  ;;  %1506 = vst [vmem:[%s2500_s17 + $0x110] sm:$0xff] %v1362_v14  ;;  %v1364_v19 = vmul.f32 %v1220_v4, %v1076_v59  ;;  %v1079_v7 = vmul.f32 %v647_v16, %v2748_v34  ;;  %v649_v9 = vadd.f32 1.0, %v1908_v21  ;;  %vm798_vm14 = vcmp.lt.f32.partialorder %v2818_v15, 0.0  ;;  %v2914_v14 = vld [vmem:[%s2354_s12 + $0x1b0] sm:$0xff]  ;;  %v2917_v4 = vld [vmem:[%s2354_s12 + $0x1b8] sm:$0xff] }
  0x9d   : > { %1507 = vst [vmem:[%s2500_s17 + $0x118] sm:$0xff] %v1363_v42  ;;  %v1365_v56 = vmul.f32 %v1221_v51, %v1077_v31  ;;  %v1222_v18 = vmul.f32 %v1078_v53, %v2786_v57  ;;  %v1080_v48 = vmul.f32 %v648_v40, %v2756_v46  ;;  %v650_v10 = vadd.f32 1.0, %v1910_v11  ;;  %v2923_v51 = vld [vmem:[%s2354_s12 + $0x1c0] sm:$0xff]  ;;  %v2927_v11 = vld [vmem:[%s2354_s12 + $0x1c8] sm:$0xff] }
  0x9e   : > { %v1912_v17 = vpop.eup %1911  ;;  %1508 = vst [vmem:[%s2500_s17 + $0x120] sm:$0xff] %v1364_v19  ;;  %v1223_v62 = vmul.f32 %v1079_v7, %v2792_v37  ;;  %v1081_v24 = vmul.f32 %v649_v9, %v2766_v22  ;;  %v367_v34 = vmul.f32 0.70710677, %v2847_v54  ;;  %v368_v50 = vmul.f32 0.70710677, %v2864_v30 }
  0x9f   : > { %v1914_v33 = vpop.eup %1913  ;;  %1509 = vst [vmem:[%s2500_s17 + $0x128] sm:$0xff] %v1365_v56  ;;  %v1366_v63 = vmul.f32 %v1222_v18, %v1078_v53  ;;  %v1224_v57 = vmul.f32 %v1080_v48, %v2801_v13  ;;  %v1082_v46 = vmul.f32 %v650_v10, %v2778_v20  ;;  %v651_v0 = vadd.f32 1.0, %v1912_v17  ;;  %v2940_v10 = vld [vmem:[%s2354_s12 + $0x1d0] sm:$0xff] }
  0xa0   : > { %v1916_v37 = vpop.eup %1915  ;;  %v1367_v3 = vmul.f32 %v1223_v62, %v1079_v7  ;;  %v1225_v22 = vmul.f32 %v1081_v24, %v2807_v45  ;;  %v652_v27 = vadd.f32 1.0, %v1914_v33  ;;  %1919 = verf.f32 %v367_v34  ;;  %v2949_v33 = vld [vmem:[%s2354_s12 + $0x1d8] sm:$0xff] }
  0xa1   : > { %1510 = vst [vmem:[%s2500_s17 + $0x130] sm:$0xff] %v1366_v63  ;;  %v1368_v36 = vmul.f32 %v1224_v57, %v1080_v48  ;;  %v1226_v32 = vmul.f32 %v1082_v46, %v938_v47  ;;  %v1083_v26 = vmul.f32 %v651_v0, %v2789_v23  ;;  %v653_v13 = vadd.f32 1.0, %v1916_v37 }
  0xa2   : > { %1511 = vst [vmem:[%s2500_s17 + $0x138] sm:$0xff] %v1367_v3  ;;  %v1369_v20 = vmul.f32 %v1225_v22, %v1081_v24  ;;  %v1084_v8 = vmul.f32 %v652_v27, %v2797_v60  ;;  %v941_v45 = vsel %vm797_vm13, -5.0, %v2228_v5  ;;  %v942_v29 = vsel %vm798_vm14, -5.0, %v2228_v5  ;;  %v2956_v22 = vld [vmem:[%s2354_s12 + $0x1e0] sm:$0xff] }
  0xa3   : > { %1512 = vst [vmem:[%s2500_s17 + $0x140] sm:$0xff] %v1368_v36  ;;  %v1370_v52 = vmul.f32 %v1226_v32, %v1082_v46  ;;  %v1227_v61 = vmul.f32 %v1083_v26, %v2830_v39  ;;  %v1085_v23 = vmul.f32 %v653_v13, %v2804_v58  ;;  %1921 = verf.f32 %v368_v50 }
  0xa4   : > { %v1918_v47 = vpop.eup %1917  ;;  %1513 = vst [vmem:[%s2500_s17 + $0x148] sm:$0xff] %v1369_v20  ;;  %v1228_v60 = vmul.f32 %v1084_v8, %v2837_v25  ;;  %v369_v41 = vmul.f32 0.70710677, %v2870_v49  ;;  %vm799_vm15 = vcmp.lt.f32.partialorder %v2847_v54, 0.0  ;;  %vm800_vm0 = vcmp.lt.f32.partialorder %v2864_v30, 0.0  ;;  %v2898_v25 = vld [vmem:[%s2354_s12 + $0x1a0] sm:$0xff] }
  0xa5   : > { %1514 = vst [vmem:[%s2500_s17 + $0x150] sm:$0xff] %v1370_v52  ;;  %v1371_v2 = vmul.f32 %v1227_v61, %v1083_v26  ;;  %v1229_v58 = vmul.f32 %v1085_v23, %v941_v45  ;;  %v654_v39 = vadd.f32 1.0, %v1918_v47  ;;  %v370_v59 = vmul.f32 0.70710677, %v2882_v38 }
  0xa6   : > { %v1372_v35 = vmul.f32 %v1228_v60, %v1084_v8  ;;  %1923 = verf.f32 %v369_v41  ;;  %vm801_vm1 = vcmp.lt.f32.partialorder %v2870_v49, 0.0  ;;  %v943_v28 = vsel %vm799_vm15, -5.0, %v2228_v5  ;;  %v2969_v8 = vld [vmem:[%s2354_s12 + $0x1e8] sm:$0xff] }
  0xa7   : > { %1515 = vst [vmem:[%s2500_s17 + $0x158] sm:$0xff] %v1371_v2  ;;  %v1373_v1 = vmul.f32 %v1229_v58, %v1085_v23  ;;  %v1086_v6 = vmul.f32 %v654_v39, %v2818_v15  ;;  %1925 = verf.f32 %v370_v59  ;;  %v371_v31 = vmul.f32 0.70710677, %v2893_v55 }
  0xa8   : > { %1516 = vst [vmem:[%s2500_s17 + $0x160] sm:$0xff] %v1372_v35  ;;  %v944_v44 = vsel %vm800_vm0, -5.0, %v2228_v5  ;;  %vm802_vm2 = vcmp.lt.f32.partialorder %v2882_v38, 0.0  ;;  %v372_v15 = vmul.f32 0.70710677, %v2898_v25  ;;  %v945_v21 = vsel %vm801_vm1, -5.0, %v2228_v5 }
  0xa9   : > { %1517 = vst [vmem:[%s2500_s17 + $0x168] sm:$0xff] %v1373_v1  ;;  %v1230_v12 = vmul.f32 %v1086_v6, %v942_v29  ;;  %1927 = verf.f32 %v371_v31  ;;  %vm803_vm3 = vcmp.lt.f32.partialorder %v2893_v55, 0.0  ;;  %v373_v42 = vmul.f32 0.70710677, %v2904_v43  ;;  %v2978_v29 = vld [vmem:[%s2354_s12 + $0x1f0] sm:$0xff] }
  0xaa   : > { %v1920_v16 = vpop.eup %1919  ;;  %1929 = verf.f32 %v372_v15  ;;  %vm804_vm4 = vcmp.lt.f32.partialorder %v2898_v25, 0.0  ;;  %v946_v19 = vsel %vm802_vm2, -5.0, %v2228_v5  ;;  %v374_v7 = vmul.f32 0.70710677, %v2914_v14 }
  0xab   : > { %v1374_v53 = vmul.f32 %v1230_v12, %v1086_v6  ;;  %v655_v40 = vadd.f32 1.0, %v1920_v16  ;;  %1931 = verf.f32 %v373_v42  ;;  %v375_v9 = vmul.f32 0.70710677, %v2917_v4 }
  0xac   : > { %v2935_v18 = vsel %vm803_vm3, -5.0, %v2228_v5  ;;  %vm805_vm5 = vcmp.lt.f32.partialorder %v2904_v43, 0.0  ;;  %v376_v48 = vmul.f32 0.70710677, %v2923_v51  ;;  %v2943_v62 = vsel %vm804_vm4, -5.0, %v2228_v5 }
  0xad   : > { %1518 = vst [vmem:[%s2500_s17 + $0x170] sm:$0xff] %v1374_v53  ;;  %v1087_v56 = vmul.f32 %v655_v40, %v2847_v54  ;;  %v1922_v17 = vpop.eup %1921  ;;  %1933 = verf.f32 %v374_v7  ;;  %vm806_vm6 = vcmp.lt.f32.partialorder %v2914_v14, 0.0  ;;  %v377_v24 = vmul.f32 0.70710677, %v2927_v11 }
  0xae   : > { %v656_v34 = vadd.f32 1.0, %v1922_v17  ;;  %1935 = verf.f32 %v375_v9  ;;  %vm807_vm7 = vcmp.lt.f32.partialorder %v2917_v4, 0.0  ;;  %v949_v57 = vsel %vm805_vm5, -5.0, %v2228_v5 }
  0xaf   : > { %v1231_v54 = vmul.f32 %v1087_v56, %v943_v28  ;;  %1937 = verf.f32 %v376_v48  ;;  %vm808_vm8 = vcmp.lt.f32.partialorder %v2923_v51, 0.0  ;;  %v378_v46 = vmul.f32 0.70710677, %v2940_v10 }
  0xb0   : > { %v1924_v63 = vpop.eup %1923  ;;  %v1088_v37 = vmul.f32 %v656_v34, %v2864_v30  ;;  %1939 = verf.f32 %v377_v24  ;;  %v950_v36 = vsel %vm806_vm6, -5.0, %v2228_v5  ;;  %v2962_v32 = vsel %vm807_vm7, -5.0, %v2228_v5 }
  0xb1   : > { %v1375_v0 = vmul.f32 %v1231_v54, %v1087_v56  ;;  %v657_v3 = vadd.f32 1.0, %v1924_v63  ;;  %v1926_v27 = vpop.eup %1925  ;;  %1941 = verf.f32 %v378_v46  ;;  %v379_v26 = vmul.f32 0.70710677, %v2949_v33 }
  0xb2   : > { %v1232_v13 = vmul.f32 %v1088_v37, %v944_v44  ;;  %v658_v20 = vadd.f32 1.0, %v1926_v27  ;;  %vm809_vm9 = vcmp.lt.f32.partialorder %v2927_v11, 0.0  ;;  %v952_v50 = vsel %vm808_vm8, -5.0, %v2228_v5 }
  0xb3   : > { %1519 = vst [vmem:[%s2500_s17 + $0x178] sm:$0xff] %v1375_v0  ;;  %v1089_v30 = vmul.f32 %v657_v3, %v2870_v49  ;;  %v1928_v45 = vpop.eup %1927  ;;  %vm810_vm10 = vcmp.lt.f32.partialorder %v2940_v10, 0.0  ;;  %1943 = verf.f32 %v379_v26  ;;  %v380_v52 = vmul.f32 0.70710677, %v2956_v22 }
  0xb4   : > { %v1930_v61 = vpop.eup %1929  ;;  %v1376_v23 = vmul.f32 %v1232_v13, %v1088_v37  ;;  %v1090_v49 = vmul.f32 %v658_v20, %v2882_v38  ;;  %v659_v60 = vadd.f32 1.0, %v1928_v45  ;;  %v953_v58 = vsel %vm809_vm9, -5.0, %v2228_v5 }
  0xb5   : > { %v1233_v47 = vmul.f32 %v1089_v30, %v945_v21  ;;  %v1932_v41 = vpop.eup %1931  ;;  %v660_v2 = vadd.f32 1.0, %v1930_v61  ;;  %1945 = verf.f32 %v380_v52  ;;  %v381_v39 = vmul.f32 0.70710677, %v2969_v8 }
  0xb6   : > { %1520 = vst [vmem:[%s2500_s17 + $0x180] sm:$0xff] %v1376_v23  ;;  %v1234_v59 = vmul.f32 %v1090_v49, %v946_v19  ;;  %v1091_v1 = vmul.f32 %v659_v60, %v2893_v55  ;;  %v661_v6 = vadd.f32 1.0, %v1932_v41  ;;  %vm811_vm11 = vcmp.lt.f32.partialorder %v2949_v33, 0.0  ;;  %v3030_v41 = vld [vmem:[%s2354_s12 + $0x210] sm:$0xff] }
  0xb7   : > { %v1377_v35 = vmul.f32 %v1233_v47, %v1089_v30  ;;  %v1934_v28 = vpop.eup %1933  ;;  %v1092_v38 = vmul.f32 %v660_v2, %v2898_v25  ;;  %1947 = verf.f32 %v381_v39  ;;  %v382_v31 = vmul.f32 0.70710677, %v2978_v29 }
  0xb8   : > { %v1936_v12 = vpop.eup %1935  ;;  %v1378_v44 = vmul.f32 %v1234_v59, %v1090_v49  ;;  %v1235_v15 = vmul.f32 %v1091_v1, %v2935_v18  ;;  %v1093_v16 = vmul.f32 %v661_v6, %v2904_v43  ;;  %v662_v21 = vadd.f32 1.0, %v1934_v28  ;;  %v2997_v43 = vld [vmem:[%s2354_s12 + $0x1f8] sm:$0xff]  ;;  %v3044_v28 = vld [vmem:[%s2354_s12 + $0x220] sm:$0xff] }
  0xb9   : > { %1521 = vst [vmem:[%s2500_s17 + $0x188] sm:$0xff] %v1377_v35  ;;  %v1938_v55 = vpop.eup %1937  ;;  %v1236_v42 = vmul.f32 %v1092_v38, %v2943_v62  ;;  %v663_v25 = vadd.f32 1.0, %v1936_v12  ;;  %v954_v53 = vsel %vm810_vm10, -5.0, %v2228_v5  ;;  %1949 = verf.f32 %v382_v31  ;;  %v3041_v6 = vld [vmem:[%s2354_s12 + $0x218] sm:$0xff] }
  0xba   : > { %v1940_v40 = vpop.eup %1939  ;;  %1522 = vst [vmem:[%s2500_s17 + $0x190] sm:$0xff] %v1378_v44  ;;  %v1379_v19 = vmul.f32 %v1235_v15, %v1091_v1  ;;  %v1237_v7 = vmul.f32 %v1093_v16, %v949_v57  ;;  %v1094_v9 = vmul.f32 %v662_v21, %v2914_v14  ;;  %v664_v56 = vadd.f32 1.0, %v1938_v55  ;;  %v3055_v15 = vld [vmem:[%s2354_s12 + $0x228] sm:$0xff] }
  0xbb   : > { %v1942_v18 = vpop.eup %1941  ;;  %v1380_v48 = vmul.f32 %v1236_v42, %v1092_v38  ;;  %v1095_v17 = vmul.f32 %v663_v25, %v2917_v4  ;;  %v665_v62 = vadd.f32 1.0, %v1940_v40  ;;  %v955_v24 = vsel %vm811_vm11, -5.0, %v2228_v5  ;;  %v3071_v40 = vld [vmem:[%s2354_s12 + $0x238] sm:$0xff] }
  0xbc   : > { %1523 = vst [vmem:[%s2500_s17 + $0x198] sm:$0xff] %v1379_v19  ;;  %v1381_v54 = vmul.f32 %v1237_v7, %v1093_v16  ;;  %v1238_v34 = vmul.f32 %v1094_v9, %v950_v36  ;;  %v1096_v63 = vmul.f32 %v664_v56, %v2923_v51  ;;  %v666_v14 = vadd.f32 1.0, %v1942_v18  ;;  %v3013_v36 = vld [vmem:[%s2354_s12 + $0x200] sm:$0xff] }
  0xbd   : > { %v1944_v57 = vpop.eup %1943  ;;  %1524 = vst [vmem:[%s2500_s17 + $0x1a0] sm:$0xff] %v1380_v48  ;;  %v1239_v46 = vmul.f32 %v1095_v17, %v2962_v32  ;;  %v1097_v0 = vmul.f32 %v665_v62, %v2927_v11  ;;  %vm812_vm12 = vcmp.lt.f32.partialorder %v2956_v22, 0.0  ;;  %v383_v4 = vmul.f32 0.70710677, %v2997_v43  ;;  %v3077_v56 = vld [vmem:[%s2354_s12 + $0x240] sm:$0xff] }
  0xbe   : > { %1525 = vst [vmem:[%s2500_s17 + $0x1a8] sm:$0xff] %v1381_v54  ;;  %v1382_v37 = vmul.f32 %v1238_v34, %v1094_v9  ;;  %v1240_v3 = vmul.f32 %v1096_v63, %v952_v50  ;;  %v1098_v27 = vmul.f32 %v666_v14, %v2940_v10  ;;  %v667_v51 = vadd.f32 1.0, %v1944_v57  ;;  %v3019_v50 = vld [vmem:[%s2354_s12 + $0x208] sm:$0xff]  ;;  %v3095_v57 = vld [vmem:[%s2354_s12 + $0x250] sm:$0xff] }
  0xbf   : > { %v1946_v26 = vpop.eup %1945  ;;  %v1383_v13 = vmul.f32 %v1239_v46, %v1095_v17  ;;  %v1241_v32 = vmul.f32 %v1097_v0, %v953_v58  ;;  %vm813_vm13 = vcmp.lt.f32.partialorder %v2969_v8, 0.0  ;;  %1951 = verf.f32 %v383_v4  ;;  %v3082_v17 = vld [vmem:[%s2354_s12 + $0x248] sm:$0xff] }
  0xc0   : > { %1526 = vst [vmem:[%s2500_s17 + $0x1b0] sm:$0xff] %v1382_v37  ;;  %v1384_v11 = vmul.f32 %v1240_v3, %v1096_v63  ;;  %v1242_v30 = vmul.f32 %v1098_v27, %v954_v53  ;;  %v1099_v20 = vmul.f32 %v667_v51, %v2949_v33  ;;  %v668_v45 = vadd.f32 1.0, %v1946_v26  ;;  %v3068_v53 = vld [vmem:[%s2354_s12 + $0x230] sm:$0xff]  ;;  %v3104_v3 = vld [vmem:[%s2354_s12 + $0x258] sm:$0xff] }
  0xc1   : > { %v1948_v10 = vpop.eup %1947  ;;  %1527 = vst [vmem:[%s2500_s17 + $0x1b8] sm:$0xff] %v1383_v13  ;;  %v1385_v52 = vmul.f32 %v1241_v32, %v1097_v0  ;;  %v956_v61 = vsel %vm812_vm12, -5.0, %v2228_v5  ;;  %vm814_vm14 = vcmp.lt.f32.partialorder %v2978_v29, 0.0  ;;  %v384_v23 = vmul.f32 0.70710677, %v3013_v36 }
  0xc2   : > { %1528 = vst [vmem:[%s2500_s17 + $0x1c0] sm:$0xff] %v1384_v11  ;;  %v1386_v47 = vmul.f32 %v1242_v30, %v1098_v27  ;;  %v1243_v33 = vmul.f32 %v1099_v20, %v955_v24  ;;  %v1100_v49 = vmul.f32 %v668_v45, %v2956_v22  ;;  %v669_v60 = vadd.f32 1.0, %v1948_v10  ;;  %v3111_v30 = vld [vmem:[%s2354_s12 + $0x260] sm:$0xff] }
  0xc3   : > { %v1950_v2 = vpop.eup %1949  ;;  %1529 = vst [vmem:[%s2500_s17 + $0x1c8] sm:$0xff] %v1385_v52  ;;  %v957_v58 = vsel %vm813_vm13, -5.0, %v2228_v5  ;;  %vm815_vm15 = vcmp.lt.f32.partialorder %v2997_v43, 0.0  ;;  %1953 = verf.f32 %v384_v23  ;;  %v385_v39 = vmul.f32 0.70710677, %v3019_v50 }
  0xc4   : > { %1530 = vst [vmem:[%s2500_s17 + $0x1d0] sm:$0xff] %v1386_v47  ;;  %v1387_v35 = vmul.f32 %v1243_v33, %v1099_v20  ;;  %v1244_v59 = vmul.f32 %v1100_v49, %v956_v61  ;;  %v1101_v22 = vmul.f32 %v669_v60, %v2969_v8  ;;  %v670_v1 = vadd.f32 1.0, %v1950_v2  ;;  %v3124_v47 = vld [vmem:[%s2354_s12 + $0x268] sm:$0xff] }
  0xc5   : > { %v958_v38 = vsel %vm814_vm14, -5.0, %v2228_v5  ;;  %vm816_vm0 = vcmp.lt.f32.partialorder %v3013_v36, 0.0  ;;  %1955 = verf.f32 %v385_v39  ;;  %v386_v31 = vmul.f32 0.70710677, %v3030_v41 }
  0xc6   : > { %1531 = vst [vmem:[%s2500_s17 + $0x1d8] sm:$0xff] %v1387_v35  ;;  %v1388_v12 = vmul.f32 %v1244_v59, %v1100_v49  ;;  %v1245_v8 = vmul.f32 %v1101_v22, %v957_v58  ;;  %v1102_v44 = vmul.f32 %v670_v1, %v2978_v29  ;;  %vm817_vm1 = vcmp.lt.f32.partialorder %v3019_v50, 0.0  ;;  %v3133_v59 = vld [vmem:[%s2354_s12 + $0x270] sm:$0xff] }
  0xc7   : > { %v959_v16 = vsel %vm815_vm15, -5.0, %v2228_v5  ;;  %1957 = verf.f32 %v386_v31  ;;  %v387_v21 = vmul.f32 0.70710677, %v3041_v6  ;;  %v388_v55 = vmul.f32 0.70710677, %v3044_v28 }
  0xc8   : > { %1532 = vst [vmem:[%s2500_s17 + $0x1e0] sm:$0xff] %v1388_v12  ;;  %v1389_v42 = vmul.f32 %v1245_v8, %v1101_v22  ;;  %v1246_v25 = vmul.f32 %v1102_v44, %v958_v38  ;;  %v960_v29 = vsel %vm816_vm0, -5.0, %v2228_v5  ;;  %vm818_vm2 = vcmp.lt.f32.partialorder %v3030_v41, 0.0 }
  0xc9   : > { %v1952_v19 = vpop.eup %1951  ;;  %v961_v7 = vsel %vm817_vm1, -5.0, %v2228_v5  ;;  %1959 = verf.f32 %v387_v21  ;;  %vm819_vm3 = vcmp.lt.f32.partialorder %v3041_v6, 0.0  ;;  %v389_v9 = vmul.f32 0.70710677, %v3055_v15 }
  0xca   : > { %1533 = vst [vmem:[%s2500_s17 + $0x1e8] sm:$0xff] %v1389_v42  ;;  %v1390_v18 = vmul.f32 %v1246_v25, %v1102_v44  ;;  %v671_v48 = vadd.f32 1.0, %v1952_v19  ;;  %1961 = verf.f32 %v388_v55  ;;  %vm820_vm4 = vcmp.lt.f32.partialorder %v3044_v28, 0.0 }
  0xcb   : > { %v962_v62 = vsel %vm818_vm2, -5.0, %v2228_v5  ;;  %1963 = verf.f32 %v389_v9  ;;  %v390_v24 = vmul.f32 0.70710677, %v3068_v53  ;;  %v391_v54 = vmul.f32 0.70710677, %v3071_v40 }
  0xcc   : > { %1534 = vst [vmem:[%s2500_s17 + $0x1f0] sm:$0xff] %v1390_v18  ;;  %v1103_v34 = vmul.f32 %v671_v48, %v2997_v43  ;;  %v3090_v63 = vsel %vm819_vm3, -5.0, %v2228_v5  ;;  %vm821_vm5 = vcmp.lt.f32.partialorder %v3055_v15, 0.0  ;;  %v392_v14 = vmul.f32 0.70710677, %v3077_v56 }
  0xcd   : > { %v1954_v46 = vpop.eup %1953  ;;  %v3098_v0 = vsel %vm820_vm4, -5.0, %v2228_v5  ;;  %1965 = verf.f32 %v390_v24  ;;  %vm822_vm6 = vcmp.lt.f32.partialorder %v3068_v53, 0.0  ;;  %v393_v4 = vmul.f32 0.70710677, %v3082_v17 }
  0xce   : > { %v1247_v43 = vmul.f32 %v1103_v34, %v959_v16  ;;  %v672_v37 = vadd.f32 1.0, %v1954_v46  ;;  %1967 = verf.f32 %v391_v54  ;;  %vm823_vm7 = vcmp.lt.f32.partialorder %v3071_v40, 0.0 }
  0xcf   : > { %v1956_v27 = vpop.eup %1955  ;;  %v965_v51 = vsel %vm821_vm5, -5.0, %v2228_v5  ;;  %1969 = verf.f32 %v392_v14  ;;  %vm824_vm8 = vcmp.lt.f32.partialorder %v3077_v56, 0.0  ;;  %v394_v26 = vmul.f32 0.70710677, %v3095_v57 }
  0xd0   : > { %v1391_v13 = vmul.f32 %v1247_v43, %v1103_v34  ;;  %v1104_v32 = vmul.f32 %v672_v37, %v3013_v36  ;;  %v673_v11 = vadd.f32 1.0, %v1956_v27  ;;  %1971 = verf.f32 %v393_v4 }
  0xd1   : > { %v1958_v20 = vpop.eup %1957  ;;  %v966_v45 = vsel %vm822_vm6, -5.0, %v2228_v5  ;;  %v3117_v10 = vsel %vm823_vm7, -5.0, %v2228_v5  ;;  %1973 = verf.f32 %v394_v26  ;;  %v395_v52 = vmul.f32 0.70710677, %v3104_v3 }
  0xd2   : > { %1535 = vst [vmem:[%s2500_s17 + $0x1f8] sm:$0xff] %v1391_v13  ;;  %v1248_v61 = vmul.f32 %v1104_v32, %v960_v29  ;;  %v1105_v36 = vmul.f32 %v673_v11, %v3019_v50  ;;  %v674_v23 = vadd.f32 1.0, %v1958_v20  ;;  %vm825_vm9 = vcmp.lt.f32.partialorder %v3082_v17, 0.0 }
  0xd3   : > { %v1960_v33 = vpop.eup %1959  ;;  %v968_v49 = vsel %vm824_vm8, -5.0, %v2228_v5  ;;  %vm826_vm10 = vcmp.lt.f32.partialorder %v3095_v57, 0.0  ;;  %1975 = verf.f32 %v395_v52  ;;  %v396_v60 = vmul.f32 0.70710677, %v3111_v30 }
  0xd4   : > { %v1962_v2 = vpop.eup %1961  ;;  %v1392_v58 = vmul.f32 %v1248_v61, %v1104_v32  ;;  %v1249_v39 = vmul.f32 %v1105_v36, %v961_v7  ;;  %v1106_v50 = vmul.f32 %v674_v23, %v3030_v41  ;;  %v675_v35 = vadd.f32 1.0, %v1960_v33 }
  0xd5   : > { %v1964_v22 = vpop.eup %1963  ;;  %v676_v1 = vadd.f32 1.0, %v1962_v2  ;;  %v969_v38 = vsel %vm825_vm9, -5.0, %v2228_v5  ;;  %1977 = verf.f32 %v396_v60  ;;  %v397_v31 = vmul.f32 0.70710677, %v3124_v47 }
  0xd6   : > { %1536 = vst [vmem:[%s2500_s17 + $0x200] sm:$0xff] %v1392_v58  ;;  %v1393_v12 = vmul.f32 %v1249_v39, %v1105_v36  ;;  %v1250_v8 = vmul.f32 %v1106_v50, %v962_v62  ;;  %v1107_v44 = vmul.f32 %v675_v35, %v3041_v6  ;;  %v677_v16 = vadd.f32 1.0, %v1964_v22  ;;  %v3185_v22 = vld [vmem:[%s2354_s12 + $0x290] sm:$0xff] }
  0xd7   : > { %v1966_v21 = vpop.eup %1965  ;;  %v1108_v41 = vmul.f32 %v676_v1, %v3044_v28  ;;  %vm827_vm11 = vcmp.lt.f32.partialorder %v3104_v3, 0.0  ;;  %1979 = verf.f32 %v397_v31  ;;  %v398_v55 = vmul.f32 0.70710677, %v3133_v59 }
  0xd8   : > { %v1968_v42 = vpop.eup %1967  ;;  %1537 = vst [vmem:[%s2500_s17 + $0x208] sm:$0xff] %v1393_v12  ;;  %v1394_v25 = vmul.f32 %v1250_v8, %v1106_v50  ;;  %v1251_v29 = vmul.f32 %v1107_v44, %v3090_v63  ;;  %v1109_v19 = vmul.f32 %v677_v16, %v3055_v15  ;;  %v678_v7 = vadd.f32 1.0, %v1966_v21  ;;  %v3152_v15 = vld [vmem:[%s2354_s12 + $0x278] sm:$0xff]  ;;  %v3199_v21 = vld [vmem:[%s2354_s12 + $0x2a0] sm:$0xff] }
  0xd9   : > { %v1970_v6 = vpop.eup %1969  ;;  %v1252_v9 = vmul.f32 %v1108_v41, %v3098_v0  ;;  %v679_v28 = vadd.f32 1.0, %v1968_v42  ;;  %v970_v18 = vsel %vm826_vm10, -5.0, %v2228_v5  ;;  %1981 = verf.f32 %v398_v55  ;;  %v3196_v16 = vld [vmem:[%s2354_s12 + $0x298] sm:$0xff] }
  0xda   : > { %v1972_v48 = vpop.eup %1971  ;;  %1538 = vst [vmem:[%s2500_s17 + $0x210] sm:$0xff] %v1394_v25  ;;  %v1395_v62 = vmul.f32 %v1251_v29, %v1107_v44  ;;  %v1253_v24 = vmul.f32 %v1109_v19, %v965_v51  ;;  %v1110_v54 = vmul.f32 %v678_v7, %v3068_v53  ;;  %v680_v34 = vadd.f32 1.0, %v1970_v6  ;;  %v3210_v29 = vld [vmem:[%s2354_s12 + $0x2a8] sm:$0xff] }
  0xdb   : > { %v1974_v63 = vpop.eup %1973  ;;  %v1396_v14 = vmul.f32 %v1252_v9, %v1108_v41  ;;  %v1111_v46 = vmul.f32 %v679_v28, %v3071_v40  ;;  %v681_v0 = vadd.f32 1.0, %v1972_v48  ;;  %v971_v4 = vsel %vm827_vm11, -5.0, %v2228_v5  ;;  %v3226_v48 = vld [vmem:[%s2354_s12 + $0x2b8] sm:$0xff] }
  0xdc   : > { %1539 = vst [vmem:[%s2500_s17 + $0x218] sm:$0xff] %v1395_v62  ;;  %v1397_v43 = vmul.f32 %v1253_v24, %v1109_v19  ;;  %v1254_v37 = vmul.f32 %v1110_v54, %v966_v45  ;;  %v1112_v27 = vmul.f32 %v680_v34, %v3077_v56  ;;  %v682_v53 = vadd.f32 1.0, %v1974_v63  ;;  %v3168_v45 = vld [vmem:[%s2354_s12 + $0x280] sm:$0xff] }
  0xdd   : > { %v1976_v51 = vpop.eup %1975  ;;  %1540 = vst [vmem:[%s2500_s17 + $0x220] sm:$0xff] %v1396_v14  ;;  %v1255_v26 = vmul.f32 %v1111_v46, %v3117_v10  ;;  %v1113_v13 = vmul.f32 %v681_v0, %v3082_v17  ;;  %vm828_vm12 = vcmp.lt.f32.partialorder %v3111_v30, 0.0  ;;  %v399_v40 = vmul.f32 0.70710677, %v3152_v15  ;;  %v3232_v34 = vld [vmem:[%s2354_s12 + $0x2c0] sm:$0xff] }
  0xde   : > { %1541 = vst [vmem:[%s2500_s17 + $0x228] sm:$0xff] %v1397_v43  ;;  %v1398_v32 = vmul.f32 %v1254_v37, %v1110_v54  ;;  %v1256_v11 = vmul.f32 %v1112_v27, %v968_v49  ;;  %v1114_v20 = vmul.f32 %v682_v53, %v3095_v57  ;;  %v683_v56 = vadd.f32 1.0, %v1976_v51  ;;  %v3174_v49 = vld [vmem:[%s2354_s12 + $0x288] sm:$0xff]  ;;  %v3250_v51 = vld [vmem:[%s2354_s12 + $0x2d0] sm:$0xff] }
  0xdf   : > { %v1978_v52 = vpop.eup %1977  ;;  %v1399_v61 = vmul.f32 %v1255_v26, %v1111_v46  ;;  %v1257_v10 = vmul.f32 %v1113_v13, %v969_v38  ;;  %vm829_vm13 = vcmp.lt.f32.partialorder %v3124_v47, 0.0  ;;  %1983 = verf.f32 %v399_v40  ;;  %v3237_v46 = vld [vmem:[%s2354_s12 + $0x2c8] sm:$0xff] }
  0xe0   : > { %1542 = vst [vmem:[%s2500_s17 + $0x230] sm:$0xff] %v1398_v32  ;;  %v1400_v17 = vmul.f32 %v1256_v11, %v1112_v27  ;;  %v1258_v36 = vmul.f32 %v1114_v20, %v970_v18  ;;  %v1115_v23 = vmul.f32 %v683_v56, %v3104_v3  ;;  %v684_v33 = vadd.f32 1.0, %v1978_v52  ;;  %v3223_v18 = vld [vmem:[%s2354_s12 + $0x2b0] sm:$0xff]  ;;  %v3259_v11 = vld [vmem:[%s2354_s12 + $0x2d8] sm:$0xff] }
  0xe1   : > { %v1980_v57 = vpop.eup %1979  ;;  %1543 = vst [vmem:[%s2500_s17 + $0x238] sm:$0xff] %v1399_v61  ;;  %v1401_v60 = vmul.f32 %v1257_v10, %v1113_v13  ;;  %v972_v2 = vsel %vm828_vm12, -5.0, %v2228_v5  ;;  %vm830_vm14 = vcmp.lt.f32.partialorder %v3133_v59, 0.0  ;;  %v400_v58 = vmul.f32 0.70710677, %v3168_v45 }
  0xe2   : > { %1544 = vst [vmem:[%s2500_s17 + $0x240] sm:$0xff] %v1400_v17  ;;  %v1402_v39 = vmul.f32 %v1258_v36, %v1114_v20  ;;  %v1259_v3 = vmul.f32 %v1115_v23, %v971_v4  ;;  %v1116_v50 = vmul.f32 %v684_v33, %v3111_v30  ;;  %v685_v35 = vadd.f32 1.0, %v1980_v57  ;;  %v3266_v36 = vld [vmem:[%s2354_s12 + $0x2e0] sm:$0xff] }
  0xe3   : > { %v1982_v1 = vpop.eup %1981  ;;  %1545 = vst [vmem:[%s2500_s17 + $0x248] sm:$0xff] %v1401_v60  ;;  %v973_v38 = vsel %vm829_vm13, -5.0, %v2228_v5  ;;  %vm831_vm15 = vcmp.lt.f32.partialorder %v3152_v15, 0.0  ;;  %1985 = verf.f32 %v400_v58  ;;  %v401_v31 = vmul.f32 0.70710677, %v3174_v49 }
  0xe4   : > { %1546 = vst [vmem:[%s2500_s17 + $0x250] sm:$0xff] %v1402_v39  ;;  %v1403_v12 = vmul.f32 %v1259_v3, %v1115_v23  ;;  %v1260_v8 = vmul.f32 %v1116_v50, %v972_v2  ;;  %v1117_v30 = vmul.f32 %v685_v35, %v3124_v47  ;;  %v686_v44 = vadd.f32 1.0, %v1982_v1  ;;  %v3279_v39 = vld [vmem:[%s2354_s12 + $0x2e8] sm:$0xff] }
  0xe5   : > { %v974_v41 = vsel %vm830_vm14, -5.0, %v2228_v5  ;;  %vm832_vm0 = vcmp.lt.f32.partialorder %v3168_v45, 0.0  ;;  %1987 = verf.f32 %v401_v31  ;;  %v402_v55 = vmul.f32 0.70710677, %v3185_v22 }
  0xe6   : > { %1547 = vst [vmem:[%s2500_s17 + $0x258] sm:$0xff] %v1403_v12  ;;  %v1404_v42 = vmul.f32 %v1260_v8, %v1116_v50  ;;  %v1261_v47 = vmul.f32 %v1117_v30, %v973_v38  ;;  %v1118_v25 = vmul.f32 %v686_v44, %v3133_v59  ;;  %vm833_vm1 = vcmp.lt.f32.partialorder %v3174_v49, 0.0  ;;  %v3288_v8 = vld [vmem:[%s2354_s12 + $0x2f0] sm:$0xff] }
  0xe7   : > { %v975_v19 = vsel %vm831_vm15, -5.0, %v2228_v5  ;;  %1989 = verf.f32 %v402_v55  ;;  %v403_v7 = vmul.f32 0.70710677, %v3196_v16  ;;  %v404_v6 = vmul.f32 0.70710677, %v3199_v21 }
  0xe8   : > { %1548 = vst [vmem:[%s2500_s17 + $0x260] sm:$0xff] %v1404_v42  ;;  %v1405_v9 = vmul.f32 %v1261_v47, %v1117_v30  ;;  %v1262_v28 = vmul.f32 %v1118_v25, %v974_v41  ;;  %v976_v59 = vsel %vm832_vm0, -5.0, %v2228_v5  ;;  %vm834_vm2 = vcmp.lt.f32.partialorder %v3185_v22, 0.0 }
  0xe9   : > { %v1984_v62 = vpop.eup %1983  ;;  %v977_v24 = vsel %vm833_vm1, -5.0, %v2228_v5  ;;  %1991 = verf.f32 %v403_v7  ;;  %vm835_vm3 = vcmp.lt.f32.partialorder %v3196_v16, 0.0  ;;  %v405_v54 = vmul.f32 0.70710677, %v3210_v29 }
  0xea   : > { %1549 = vst [vmem:[%s2500_s17 + $0x268] sm:$0xff] %v1405_v9  ;;  %v1406_v63 = vmul.f32 %v1262_v28, %v1118_v25  ;;  %v687_v14 = vadd.f32 1.0, %v1984_v62  ;;  %1993 = verf.f32 %v404_v6  ;;  %vm836_vm4 = vcmp.lt.f32.partialorder %v3199_v21, 0.0 }
  0xeb   : > { %v978_v0 = vsel %vm834_vm2, -5.0, %v2228_v5  ;;  %1995 = verf.f32 %v405_v54  ;;  %v406_v4 = vmul.f32 0.70710677, %v3223_v18  ;;  %v407_v43 = vmul.f32 0.70710677, %v3226_v48 }
  0xec   : > { %1550 = vst [vmem:[%s2500_s17 + $0x270] sm:$0xff] %v1406_v63  ;;  %v1119_v37 = vmul.f32 %v687_v14, %v3152_v15  ;;  %v3245_v27 = vsel %vm835_vm3, -5.0, %v2228_v5  ;;  %vm837_vm5 = vcmp.lt.f32.partialorder %v3210_v29, 0.0  ;;  %v408_v53 = vmul.f32 0.70710677, %v3232_v34 }
  0xed   : > { %v1986_v26 = vpop.eup %1985  ;;  %v3253_v13 = vsel %vm836_vm4, -5.0, %v2228_v5  ;;  %1997 = verf.f32 %v406_v4  ;;  %vm838_vm6 = vcmp.lt.f32.partialorder %v3223_v18, 0.0  ;;  %v409_v40 = vmul.f32 0.70710677, %v3237_v46 }
  0xee   : > { %v1263_v15 = vmul.f32 %v1119_v37, %v975_v19  ;;  %v688_v32 = vadd.f32 1.0, %v1986_v26  ;;  %1999 = verf.f32 %v407_v43  ;;  %vm839_vm7 = vcmp.lt.f32.partialorder %v3226_v48, 0.0 }
  0xef   : > { %v1988_v20 = vpop.eup %1987  ;;  %v981_v56 = vsel %vm837_vm5, -5.0, %v2228_v5  ;;  %2001 = verf.f32 %v408_v53  ;;  %vm840_vm8 = vcmp.lt.f32.partialorder %v3232_v34, 0.0  ;;  %v410_v52 = vmul.f32 0.70710677, %v3250_v51 }
  0xf0   : > { %v1407_v61 = vmul.f32 %v1263_v15, %v1119_v37  ;;  %v1120_v10 = vmul.f32 %v688_v32, %v3168_v45  ;;  %v689_v17 = vadd.f32 1.0, %v1988_v20  ;;  %2003 = verf.f32 %v409_v40 }
  0xf1   : > { %v1990_v23 = vpop.eup %1989  ;;  %v982_v33 = vsel %vm838_vm6, -5.0, %v2228_v5  ;;  %v3272_v57 = vsel %vm839_vm7, -5.0, %v2228_v5  ;;  %2005 = verf.f32 %v410_v52  ;;  %v411_v60 = vmul.f32 0.70710677, %v3259_v11 }
  0xf2   : > { %1551 = vst [vmem:[%s2500_s17 + $0x278] sm:$0xff] %v1407_v61  ;;  %v1264_v2 = vmul.f32 %v1120_v10, %v976_v59  ;;  %v1121_v45 = vmul.f32 %v689_v17, %v3174_v49  ;;  %v690_v58 = vadd.f32 1.0, %v1990_v23  ;;  %vm841_vm9 = vcmp.lt.f32.partialorder %v3237_v46, 0.0 }
  0xf3   : > { %v1992_v3 = vpop.eup %1991  ;;  %v984_v50 = vsel %vm840_vm8, -5.0, %v2228_v5  ;;  %vm842_vm10 = vcmp.lt.f32.partialorder %v3250_v51, 0.0  ;;  %2007 = verf.f32 %v411_v60  ;;  %v412_v35 = vmul.f32 0.70710677, %v3266_v36 }
  0xf4   : > { %v1994_v1 = vpop.eup %1993  ;;  %v1408_v38 = vmul.f32 %v1264_v2, %v1120_v10  ;;  %v1265_v31 = vmul.f32 %v1121_v45, %v977_v24  ;;  %v1122_v49 = vmul.f32 %v690_v58, %v3185_v22  ;;  %v691_v12 = vadd.f32 1.0, %v1992_v3 }
  0xf5   : > { %v1996_v30 = vpop.eup %1995  ;;  %v692_v44 = vadd.f32 1.0, %v1994_v1  ;;  %v985_v41 = vsel %vm841_vm9, -5.0, %v2228_v5  ;;  %2009 = verf.f32 %v412_v35  ;;  %v413_v55 = vmul.f32 0.70710677, %v3279_v39 }
  0xf6   : > { %1552 = vst [vmem:[%s2500_s17 + $0x280] sm:$0xff] %v1408_v38  ;;  %v1409_v42 = vmul.f32 %v1265_v31, %v1121_v45  ;;  %v1266_v47 = vmul.f32 %v1122_v49, %v978_v0  ;;  %v1123_v25 = vmul.f32 %v691_v12, %v3196_v16  ;;  %v693_v19 = vadd.f32 1.0, %v1996_v30  ;;  %v3340_v30 = vld [vmem:[%s2354_s12 + $0x310] sm:$0xff] }
  0xf7   : > { %v1998_v7 = vpop.eup %1997  ;;  %v1124_v22 = vmul.f32 %v692_v44, %v3199_v21  ;;  %vm843_vm11 = vcmp.lt.f32.partialorder %v3259_v11, 0.0  ;;  %2011 = verf.f32 %v413_v55  ;;  %v414_v6 = vmul.f32 0.70710677, %v3288_v8 }
  0xf8   : > { %v2000_v9 = vpop.eup %1999  ;;  %1553 = vst [vmem:[%s2500_s17 + $0x288] sm:$0xff] %v1409_v42  ;;  %v1410_v28 = vmul.f32 %v1266_v47, %v1122_v49  ;;  %v1267_v59 = vmul.f32 %v1123_v25, %v3245_v27  ;;  %v1125_v62 = vmul.f32 %v693_v19, %v3210_v29  ;;  %v694_v24 = vadd.f32 1.0, %v1998_v7  ;;  %v3307_v29 = vld [vmem:[%s2354_s12 + $0x2f8] sm:$0xff]  ;;  %v3354_v7 = vld [vmem:[%s2354_s12 + $0x320] sm:$0xff] }
  0xf9   : > { %v2002_v16 = vpop.eup %2001  ;;  %v1268_v54 = vmul.f32 %v1124_v22, %v3253_v13  ;;  %v695_v21 = vadd.f32 1.0, %v2000_v9  ;;  %v986_v63 = vsel %vm842_vm10, -5.0, %v2228_v5  ;;  %2013 = verf.f32 %v414_v6  ;;  %v3351_v19 = vld [vmem:[%s2354_s12 + $0x318] sm:$0xff] }
  0xfa   : > { %v2004_v14 = vpop.eup %2003  ;;  %1554 = vst [vmem:[%s2500_s17 + $0x290] sm:$0xff] %v1410_v28  ;;  %v1411_v0 = vmul.f32 %v1267_v59, %v1123_v25  ;;  %v1269_v4 = vmul.f32 %v1125_v62, %v981_v56  ;;  %v1126_v43 = vmul.f32 %v694_v24, %v3223_v18  ;;  %v696_v37 = vadd.f32 1.0, %v2002_v16  ;;  %v3365_v59 = vld [vmem:[%s2354_s12 + $0x328] sm:$0xff] }
  0xfb   : > { %v2006_v27 = vpop.eup %2005  ;;  %v1412_v53 = vmul.f32 %v1268_v54, %v1124_v22  ;;  %v1127_v26 = vmul.f32 %v695_v21, %v3226_v48  ;;  %v697_v13 = vadd.f32 1.0, %v2004_v14  ;;  %v987_v40 = vsel %vm843_vm11, -5.0, %v2228_v5  ;;  %v3381_v14 = vld [vmem:[%s2354_s12 + $0x338] sm:$0xff] }
  0xfc   : > { %1555 = vst [vmem:[%s2500_s17 + $0x298] sm:$0xff] %v1411_v0  ;;  %v1413_v15 = vmul.f32 %v1269_v4, %v1125_v62  ;;  %v1270_v32 = vmul.f32 %v1126_v43, %v982_v33  ;;  %v1128_v20 = vmul.f32 %v696_v37, %v3232_v34  ;;  %v698_v18 = vadd.f32 1.0, %v2006_v27  ;;  %v3323_v33 = vld [vmem:[%s2354_s12 + $0x300] sm:$0xff] }
  0xfd   : > { %v2008_v56 = vpop.eup %2007  ;;  %1556 = vst [vmem:[%s2500_s17 + $0x2a0] sm:$0xff] %v1412_v53  ;;  %v1271_v52 = vmul.f32 %v1127_v26, %v3272_v57  ;;  %v1129_v61 = vmul.f32 %v697_v13, %v3237_v46  ;;  %vm844_vm12 = vcmp.lt.f32.partialorder %v3266_v36, 0.0  ;;  %v415_v48 = vmul.f32 0.70710677, %v3307_v29  ;;  %v3387_v37 = vld [vmem:[%s2354_s12 + $0x340] sm:$0xff] }
  0xfe   : > { %1557 = vst [vmem:[%s2500_s17 + $0x2a8] sm:$0xff] %v1413_v15  ;;  %v1414_v10 = vmul.f32 %v1270_v32, %v1126_v43  ;;  %v1272_v17 = vmul.f32 %v1128_v20, %v984_v50  ;;  %v1130_v23 = vmul.f32 %v698_v18, %v3250_v51  ;;  %v699_v34 = vadd.f32 1.0, %v2008_v56  ;;  %v3329_v50 = vld [vmem:[%s2354_s12 + $0x308] sm:$0xff]  ;;  %v3405_v56 = vld [vmem:[%s2354_s12 + $0x350] sm:$0xff] }
  0xff   : > { %v2010_v60 = vpop.eup %2009  ;;  %v1415_v2 = vmul.f32 %v1271_v52, %v1127_v26  ;;  %v1273_v57 = vmul.f32 %v1129_v61, %v985_v41  ;;  %vm845_vm13 = vcmp.lt.f32.partialorder %v3279_v39, 0.0  ;;  %2015 = verf.f32 %v415_v48  ;;  %v3392_v26 = vld [vmem:[%s2354_s12 + $0x348] sm:$0xff] }
 0x100   : > { %1558 = vst [vmem:[%s2500_s17 + $0x2b0] sm:$0xff] %v1414_v10  ;;  %v1416_v46 = vmul.f32 %v1272_v17, %v1128_v20  ;;  %v1274_v45 = vmul.f32 %v1130_v23, %v986_v63  ;;  %v1131_v58 = vmul.f32 %v699_v34, %v3259_v11  ;;  %v700_v3 = vadd.f32 1.0, %v2010_v60  ;;  %v3378_v63 = vld [vmem:[%s2354_s12 + $0x330] sm:$0xff]  ;;  %v3414_v17 = vld [vmem:[%s2354_s12 + $0x358] sm:$0xff] }
 0x101   : > { %v2012_v51 = vpop.eup %2011  ;;  %1559 = vst [vmem:[%s2500_s17 + $0x2b8] sm:$0xff] %v1415_v2  ;;  %v1417_v35 = vmul.f32 %v1273_v57, %v1129_v61  ;;  %v988_v1 = vsel %vm844_vm12, -5.0, %v2228_v5  ;;  %vm846_vm14 = vcmp.lt.f32.partialorder %v3288_v8, 0.0  ;;  %v416_v38 = vmul.f32 0.70710677, %v3323_v33 }
 0x102   : > { %1560 = vst [vmem:[%s2500_s17 + $0x2c0] sm:$0xff] %v1416_v46  ;;  %v1418_v31 = vmul.f32 %v1274_v45, %v1130_v23  ;;  %v1275_v11 = vmul.f32 %v1131_v58, %v987_v40  ;;  %v1132_v49 = vmul.f32 %v700_v3, %v3266_v36  ;;  %v701_v12 = vadd.f32 1.0, %v2012_v51  ;;  %v3421_v45 = vld [vmem:[%s2354_s12 + $0x360] sm:$0xff] }
 0x103   : > { %v2014_v44 = vpop.eup %2013  ;;  %1561 = vst [vmem:[%s2500_s17 + $0x2c8] sm:$0xff] %v1417_v35  ;;  %v989_v41 = vsel %vm845_vm13, -5.0, %v2228_v5  ;;  %vm847_vm15 = vcmp.lt.f32.partialorder %v3307_v29, 0.0  ;;  %2017 = verf.f32 %v416_v38  ;;  %v417_v55 = vmul.f32 0.70710677, %v3329_v50 }
 0x104   : > { %1562 = vst [vmem:[%s2500_s17 + $0x2d0] sm:$0xff] %v1418_v31  ;;  %v1419_v42 = vmul.f32 %v1275_v11, %v1131_v58  ;;  %v1276_v47 = vmul.f32 %v1132_v49, %v988_v1  ;;  %v1133_v36 = vmul.f32 %v701_v12, %v3279_v39  ;;  %v702_v25 = vadd.f32 1.0, %v2014_v44  ;;  %v3434_v31 = vld [vmem:[%s2354_s12 + $0x368] sm:$0xff] }
 0x105   : > { %v990_v22 = vsel %vm846_vm14, -5.0, %v2228_v5  ;;  %vm848_vm0 = vcmp.lt.f32.partialorder %v3323_v33, 0.0  ;;  %2019 = verf.f32 %v417_v55  ;;  %v418_v6 = vmul.f32 0.70710677, %v3340_v30 }
 0x106   : > { %1563 = vst [vmem:[%s2500_s17 + $0x2d8] sm:$0xff] %v1419_v42  ;;  %v1420_v9 = vmul.f32 %v1276_v47, %v1132_v49  ;;  %v1277_v39 = vmul.f32 %v1133_v36, %v989_v41  ;;  %v1134_v28 = vmul.f32 %v702_v25, %v3288_v8  ;;  %vm849_vm1 = vcmp.lt.f32.partialorder %v3329_v50, 0.0  ;;  %v3443_v47 = vld [vmem:[%s2354_s12 + $0x370] sm:$0xff] }
 0x107   : > { %v991_v62 = vsel %vm847_vm15, -5.0, %v2228_v5  ;;  %2021 = verf.f32 %v418_v6  ;;  %v419_v24 = vmul.f32 0.70710677, %v3351_v19  ;;  %v420_v16 = vmul.f32 0.70710677, %v3354_v7 }
 0x108   : > { %1564 = vst [vmem:[%s2500_s17 + $0x2e0] sm:$0xff] %v1420_v9  ;;  %v1421_v54 = vmul.f32 %v1277_v39, %v1133_v36  ;;  %v1278_v21 = vmul.f32 %v1134_v28, %v990_v22  ;;  %v992_v8 = vsel %vm848_vm0, -5.0, %v2228_v5  ;;  %vm850_vm2 = vcmp.lt.f32.partialorder %v3340_v30, 0.0 }
 0x109   : > { %v2016_v0 = vpop.eup %2015  ;;  %v993_v4 = vsel %vm849_vm1, -5.0, %v2228_v5  ;;  %2023 = verf.f32 %v419_v24  ;;  %vm851_vm3 = vcmp.lt.f32.partialorder %v3351_v19, 0.0  ;;  %v421_v43 = vmul.f32 0.70710677, %v3365_v59 }
 0x10a   : > { %1565 = vst [vmem:[%s2500_s17 + $0x2e8] sm:$0xff] %v1421_v54  ;;  %v1422_v27 = vmul.f32 %v1278_v21, %v1134_v28  ;;  %v703_v53 = vadd.f32 1.0, %v2016_v0  ;;  %2025 = verf.f32 %v420_v16  ;;  %vm852_vm4 = vcmp.lt.f32.partialorder %v3354_v7, 0.0 }
 0x10b   : > { %v994_v13 = vsel %vm850_vm2, -5.0, %v2228_v5  ;;  %2027 = verf.f32 %v421_v43  ;;  %v422_v40 = vmul.f32 0.70710677, %v3378_v63  ;;  %v423_v15 = vmul.f32 0.70710677, %v3381_v14 }
 0x10c   : > { %1566 = vst [vmem:[%s2500_s17 + $0x2f0] sm:$0xff] %v1422_v27  ;;  %v1135_v32 = vmul.f32 %v703_v53, %v3307_v29  ;;  %v3400_v20 = vsel %vm851_vm3, -5.0, %v2228_v5  ;;  %vm853_vm5 = vcmp.lt.f32.partialorder %v3365_v59, 0.0  ;;  %v424_v18 = vmul.f32 0.70710677, %v3387_v37 }
 0x10d   : > { %v2018_v52 = vpop.eup %2017  ;;  %v3408_v61 = vsel %vm852_vm4, -5.0, %v2228_v5  ;;  %2029 = verf.f32 %v422_v40  ;;  %vm854_vm6 = vcmp.lt.f32.partialorder %v3378_v63, 0.0  ;;  %v425_v48 = vmul.f32 0.70710677, %v3392_v26 }
 0x10e   : > { %v1279_v29 = vmul.f32 %v1135_v32, %v991_v62  ;;  %v704_v10 = vadd.f32 1.0, %v2018_v52  ;;  %2031 = verf.f32 %v423_v15  ;;  %vm855_vm7 = vcmp.lt.f32.partialorder %v3381_v14, 0.0 }
 0x10f   : > { %v2020_v23 = vpop.eup %2019  ;;  %v997_v34 = vsel %vm853_vm5, -5.0, %v2228_v5  ;;  %2033 = verf.f32 %v424_v18  ;;  %vm856_vm8 = vcmp.lt.f32.partialorder %v3387_v37, 0.0  ;;  %v426_v60 = vmul.f32 0.70710677, %v3405_v56 }
 0x110   : > { %v1423_v2 = vmul.f32 %v1279_v29, %v1135_v32  ;;  %v1136_v57 = vmul.f32 %v704_v10, %v3323_v33  ;;  %v705_v46 = vadd.f32 1.0, %v2020_v23  ;;  %2035 = verf.f32 %v425_v48 }
 0x111   : > { %v2022_v58 = vpop.eup %2021  ;;  %v998_v3 = vsel %vm854_vm6, -5.0, %v2228_v5  ;;  %v3427_v51 = vsel %vm855_vm7, -5.0, %v2228_v5  ;;  %2037 = verf.f32 %v426_v60  ;;  %v427_v35 = vmul.f32 0.70710677, %v3414_v17 }
 0x112   : > { %1567 = vst [vmem:[%s2500_s17 + $0x2f8] sm:$0xff] %v1423_v2  ;;  %v1280_v1 = vmul.f32 %v1136_v57, %v992_v8  ;;  %v1137_v33 = vmul.f32 %v705_v46, %v3329_v50  ;;  %v706_v38 = vadd.f32 1.0, %v2022_v58  ;;  %vm857_vm9 = vcmp.lt.f32.partialorder %v3392_v26, 0.0 }
 0x113   : > { %v2024_v11 = vpop.eup %2023  ;;  %v1000_v49 = vsel %vm856_vm8, -5.0, %v2228_v5  ;;  %vm858_vm10 = vcmp.lt.f32.partialorder %v3405_v56, 0.0  ;;  %2039 = verf.f32 %v427_v35  ;;  %v428_v12 = vmul.f32 0.70710677, %v3421_v45 }
 0x114   : > { %v2026_v44 = vpop.eup %2025  ;;  %v1424_v41 = vmul.f32 %v1280_v1, %v1136_v57  ;;  %v1281_v55 = vmul.f32 %v1137_v33, %v993_v4  ;;  %v1138_v50 = vmul.f32 %v706_v38, %v3340_v30  ;;  %v707_v42 = vadd.f32 1.0, %v2024_v11 }
 0x115   : > { %v2028_v36 = vpop.eup %2027  ;;  %v708_v25 = vadd.f32 1.0, %v2026_v44  ;;  %v1001_v22 = vsel %vm857_vm9, -5.0, %v2228_v5  ;;  %2041 = verf.f32 %v428_v12  ;;  %v429_v6 = vmul.f32 0.70710677, %v3434_v31 }
 0x116   : > { %1568 = vst [vmem:[%s2500_s17 + $0x300] sm:$0xff] %v1424_v41  ;;  %v1425_v9 = vmul.f32 %v1281_v55, %v1137_v33  ;;  %v1282_v39 = vmul.f32 %v1138_v50, %v994_v13  ;;  %v1139_v28 = vmul.f32 %v707_v42, %v3351_v19  ;;  %v709_v62 = vadd.f32 1.0, %v2028_v36  ;;  %v3495_v36 = vld [vmem:[%s2354_s12 + $0x390] sm:$0xff] }
 0x117   : > { %v2030_v24 = vpop.eup %2029  ;;  %v1140_v30 = vmul.f32 %v708_v25, %v3354_v7  ;;  %vm859_vm11 = vcmp.lt.f32.partialorder %v3414_v17, 0.0  ;;  %2043 = verf.f32 %v429_v6  ;;  %v430_v16 = vmul.f32 0.70710677, %v3443_v47 }
 0x118   : > { %v2032_v54 = vpop.eup %2031  ;;  %1569 = vst [vmem:[%s2500_s17 + $0x308] sm:$0xff] %v1425_v9  ;;  %v1426_v21 = vmul.f32 %v1282_v39, %v1138_v50  ;;  %v1283_v8 = vmul.f32 %v1139_v28, %v3400_v20  ;;  %v1141_v0 = vmul.f32 %v709_v62, %v3365_v59  ;;  %v710_v4 = vadd.f32 1.0, %v2030_v24  ;;  %v3462_v59 = vld [vmem:[%s2354_s12 + $0x378] sm:$0xff]  ;;  %v3509_v24 = vld [vmem:[%s2354_s12 + $0x3a0] sm:$0xff] }
 0x119   : > { %v2034_v19 = vpop.eup %2033  ;;  %v1284_v43 = vmul.f32 %v1140_v30, %v3408_v61  ;;  %v711_v7 = vadd.f32 1.0, %v2032_v54  ;;  %v1002_v27 = vsel %vm858_vm10, -5.0, %v2228_v5  ;;  %2045 = verf.f32 %v430_v16  ;;  %v3506_v62 = vld [vmem:[%s2354_s12 + $0x398] sm:$0xff] }
 0x11a   : > { %v2036_v53 = vpop.eup %2035  ;;  %1570 = vst [vmem:[%s2500_s17 + $0x310] sm:$0xff] %v1426_v21  ;;  %v1427_v13 = vmul.f32 %v1283_v8, %v1139_v28  ;;  %v1285_v40 = vmul.f32 %v1141_v0, %v997_v34  ;;  %v1142_v15 = vmul.f32 %v710_v4, %v3378_v63  ;;  %v712_v32 = vadd.f32 1.0, %v2034_v19  ;;  %v3520_v8 = vld [vmem:[%s2354_s12 + $0x3a8] sm:$0xff] }
 0x11b   : > { %v2038_v20 = vpop.eup %2037  ;;  %v1428_v18 = vmul.f32 %v1284_v43, %v1140_v30  ;;  %v1143_v52 = vmul.f32 %v711_v7, %v3381_v14  ;;  %v713_v61 = vadd.f32 1.0, %v2036_v53  ;;  %v1003_v48 = vsel %vm859_vm11, -5.0, %v2228_v5  ;;  %v3536_v53 = vld [vmem:[%s2354_s12 + $0x3b8] sm:$0xff] }
 0x11c   : > { %1571 = vst [vmem:[%s2500_s17 + $0x318] sm:$0xff] %v1427_v13  ;;  %v1429_v29 = vmul.f32 %v1285_v40, %v1141_v0  ;;  %v1286_v10 = vmul.f32 %v1142_v15, %v998_v3  ;;  %v1144_v23 = vmul.f32 %v712_v32, %v3387_v37  ;;  %v714_v63 = vadd.f32 1.0, %v2038_v20  ;;  %v3478_v3 = vld [vmem:[%s2354_s12 + $0x380] sm:$0xff] }
 0x11d   : > { %v2040_v34 = vpop.eup %2039  ;;  %1572 = vst [vmem:[%s2500_s17 + $0x320] sm:$0xff] %v1428_v18  ;;  %v1287_v60 = vmul.f32 %v1143_v52, %v3427_v51  ;;  %v1145_v2 = vmul.f32 %v713_v61, %v3392_v26  ;;  %vm860_vm12 = vcmp.lt.f32.partialorder %v3421_v45, 0.0  ;;  %v431_v14 = vmul.f32 0.70710677, %v3462_v59  ;;  %v3542_v32 = vld [vmem:[%s2354_s12 + $0x3c0] sm:$0xff] }
 0x11e   : > { %1573 = vst [vmem:[%s2500_s17 + $0x328] sm:$0xff] %v1429_v29  ;;  %v1430_v57 = vmul.f32 %v1286_v10, %v1142_v15  ;;  %v1288_v46 = vmul.f32 %v1144_v23, %v1000_v49  ;;  %v1146_v58 = vmul.f32 %v714_v63, %v3405_v56  ;;  %v715_v37 = vadd.f32 1.0, %v2040_v34  ;;  %v3484_v49 = vld [vmem:[%s2354_s12 + $0x388] sm:$0xff]  ;;  %v3560_v34 = vld [vmem:[%s2354_s12 + $0x3d0] sm:$0xff] }
 0x11f   : > { %v2042_v35 = vpop.eup %2041  ;;  %v1431_v1 = vmul.f32 %v1287_v60, %v1143_v52  ;;  %v1289_v51 = vmul.f32 %v1145_v2, %v1001_v22  ;;  %vm861_vm13 = vcmp.lt.f32.partialorder %v3434_v31, 0.0  ;;  %2047 = verf.f32 %v431_v14  ;;  %v3547_v52 = vld [vmem:[%s2354_s12 + $0x3c8] sm:$0xff] }
 0x120   : > { %1574 = vst [vmem:[%s2500_s17 + $0x330] sm:$0xff] %v1430_v57  ;;  %v1432_v26 = vmul.f32 %v1288_v46, %v1144_v23  ;;  %v1290_v33 = vmul.f32 %v1146_v58, %v1002_v27  ;;  %v1147_v38 = vmul.f32 %v715_v37, %v3414_v17  ;;  %v716_v11 = vadd.f32 1.0, %v2042_v35  ;;  %v3533_v27 = vld [vmem:[%s2354_s12 + $0x3b0] sm:$0xff]  ;;  %v3569_v46 = vld [vmem:[%s2354_s12 + $0x3d8] sm:$0xff] }
 0x121   : > { %v2044_v56 = vpop.eup %2043  ;;  %1575 = vst [vmem:[%s2500_s17 + $0x338] sm:$0xff] %v1431_v1  ;;  %v1433_v12 = vmul.f32 %v1289_v51, %v1145_v2  ;;  %v1004_v44 = vsel %vm860_vm12, -5.0, %v2228_v5  ;;  %vm862_vm14 = vcmp.lt.f32.partialorder %v3443_v47, 0.0  ;;  %v432_v41 = vmul.f32 0.70710677, %v3478_v3 }
 0x122   : > { %1576 = vst [vmem:[%s2500_s17 + $0x340] sm:$0xff] %v1432_v26  ;;  %v1434_v55 = vmul.f32 %v1290_v33, %v1146_v58  ;;  %v1291_v17 = vmul.f32 %v1147_v38, %v1003_v48  ;;  %v1148_v50 = vmul.f32 %v716_v11, %v3421_v45  ;;  %v717_v42 = vadd.f32 1.0, %v2044_v56  ;;  %v3576_v33 = vld [vmem:[%s2354_s12 + $0x3e0] sm:$0xff] }
 0x123   : > { %v2046_v25 = vpop.eup %2045  ;;  %1577 = vst [vmem:[%s2500_s17 + $0x348] sm:$0xff] %v1433_v12  ;;  %v1005_v22 = vsel %vm861_vm13, -5.0, %v2228_v5  ;;  %vm863_vm15 = vcmp.lt.f32.partialorder %v3462_v59, 0.0  ;;  %2049 = verf.f32 %v432_v41  ;;  %v433_v6 = vmul.f32 0.70710677, %v3484_v49 }
 0x124   : > { %1578 = vst [vmem:[%s2500_s17 + $0x350] sm:$0xff] %v1434_v55  ;;  %v1435_v9 = vmul.f32 %v1291_v17, %v1147_v38  ;;  %v1292_v39 = vmul.f32 %v1148_v50, %v1004_v44  ;;  %v1149_v45 = vmul.f32 %v717_v42, %v3434_v31  ;;  %v718_v28 = vadd.f32 1.0, %v2046_v25  ;;  %v3589_v55 = vld [vmem:[%s2354_s12 + $0x3e8] sm:$0xff] }
 0x125   : > { %v1006_v30 = vsel %vm862_vm14, -5.0, %v2228_v5  ;;  %vm864_vm0 = vcmp.lt.f32.partialorder %v3478_v3, 0.0  ;;  %2051 = verf.f32 %v433_v6  ;;  %v434_v16 = vmul.f32 0.70710677, %v3495_v36 }
 0x126   : > { %1579 = vst [vmem:[%s2500_s17 + $0x358] sm:$0xff] %v1435_v9  ;;  %v1436_v54 = vmul.f32 %v1292_v39, %v1148_v50  ;;  %v1293_v31 = vmul.f32 %v1149_v45, %v1005_v22  ;;  %v1150_v21 = vmul.f32 %v718_v28, %v3443_v47  ;;  %vm865_vm1 = vcmp.lt.f32.partialorder %v3484_v49, 0.0  ;;  %v3598_v39 = vld [vmem:[%s2354_s12 + $0x3f0] sm:$0xff] }
 0x127   : > { %v1007_v0 = vsel %vm863_vm15, -5.0, %v2228_v5  ;;  %2053 = verf.f32 %v434_v16  ;;  %v435_v4 = vmul.f32 0.70710677, %v3506_v62  ;;  %v436_v19 = vmul.f32 0.70710677, %v3509_v24 }
 0x128   : > { %1580 = vst [vmem:[%s2500_s17 + $0x360] sm:$0xff] %v1436_v54  ;;  %v1437_v43 = vmul.f32 %v1293_v31, %v1149_v45  ;;  %v1294_v7 = vmul.f32 %v1150_v21, %v1006_v30  ;;  %v1008_v47 = vsel %vm864_vm0, -5.0, %v2228_v5  ;;  %vm866_vm2 = vcmp.lt.f32.partialorder %v3495_v36, 0.0 }
 0x129   : > { %v2048_v13 = vpop.eup %2047  ;;  %v1009_v40 = vsel %vm865_vm1, -5.0, %v2228_v5  ;;  %2055 = verf.f32 %v435_v4  ;;  %vm867_vm3 = vcmp.lt.f32.partialorder %v3506_v62, 0.0  ;;  %v437_v15 = vmul.f32 0.70710677, %v3520_v8 }
 0x12a   : > { %1581 = vst [vmem:[%s2500_s17 + $0x368] sm:$0xff] %v1437_v43  ;;  %v1438_v20 = vmul.f32 %v1294_v7, %v1150_v21  ;;  %v719_v18 = vadd.f32 1.0, %v2048_v13  ;;  %2057 = verf.f32 %v436_v19  ;;  %vm868_vm4 = vcmp.lt.f32.partialorder %v3509_v24, 0.0 }
 0x12b   : > { %v1010_v61 = vsel %vm866_vm2, -5.0, %v2228_v5  ;;  %2059 = verf.f32 %v437_v15  ;;  %v438_v48 = vmul.f32 0.70710677, %v3533_v27  ;;  %v439_v29 = vmul.f32 0.70710677, %v3536_v53 }
 0x12c   : > { %1582 = vst [vmem:[%s2500_s17 + $0x370] sm:$0xff] %v1438_v20  ;;  %v1151_v10 = vmul.f32 %v719_v18, %v3462_v59  ;;  %v3555_v23 = vsel %vm867_vm3, -5.0, %v2228_v5  ;;  %vm869_vm5 = vcmp.lt.f32.partialorder %v3520_v8, 0.0  ;;  %v440_v63 = vmul.f32 0.70710677, %v3542_v32 }
 0x12d   : > { %v2050_v60 = vpop.eup %2049  ;;  %v3563_v2 = vsel %vm868_vm4, -5.0, %v2228_v5  ;;  %2061 = verf.f32 %v438_v48  ;;  %vm870_vm6 = vcmp.lt.f32.partialorder %v3533_v27, 0.0  ;;  %v441_v14 = vmul.f32 0.70710677, %v3547_v52 }
 0x12e   : > { %v1295_v59 = vmul.f32 %v1151_v10, %v1007_v0  ;;  %v720_v57 = vadd.f32 1.0, %v2050_v60  ;;  %2063 = verf.f32 %v439_v29  ;;  %vm871_vm7 = vcmp.lt.f32.partialorder %v3536_v53, 0.0 }
 0x12f   : > { %v2052_v58 = vpop.eup %2051  ;;  %v1013_v37 = vsel %vm869_vm5, -5.0, %v2228_v5  ;;  %2065 = verf.f32 %v440_v63  ;;  %vm872_vm8 = vcmp.lt.f32.partialorder %v3542_v32, 0.0  ;;  %v442_v35 = vmul.f32 0.70710677, %v3560_v34 }
 0x130   : > { %v1439_v1 = vmul.f32 %v1295_v59, %v1151_v10  ;;  %v1152_v51 = vmul.f32 %v720_v57, %v3478_v3  ;;  %v721_v26 = vadd.f32 1.0, %v2052_v58  ;;  %2067 = verf.f32 %v441_v14 }
 0x131   : > { %v2054_v38 = vpop.eup %2053  ;;  %v1014_v11 = vsel %vm870_vm6, -5.0, %v2228_v5  ;;  %v3582_v56 = vsel %vm871_vm7, -5.0, %v2228_v5  ;;  %2069 = verf.f32 %v442_v35  ;;  %v443_v12 = vmul.f32 0.70710677, %v3569_v46 }
 0x132   : > { %1583 = vst [vmem:[%s2500_s17 + $0x378] sm:$0xff] %v1439_v1  ;;  %v1296_v44 = vmul.f32 %v1152_v51, %v1008_v47  ;;  %v1153_v3 = vmul.f32 %v721_v26, %v3484_v49  ;;  %v722_v41 = vadd.f32 1.0, %v2054_v38  ;;  %vm873_vm9 = vcmp.lt.f32.partialorder %v3547_v52, 0.0 }
 0x133   : > { %v2056_v17 = vpop.eup %2055  ;;  %v1016_v50 = vsel %vm872_vm8, -5.0, %v2228_v5  ;;  %vm874_vm10 = vcmp.lt.f32.partialorder %v3560_v34, 0.0  ;;  %2071 = verf.f32 %v443_v12  ;;  %v444_v42 = vmul.f32 0.70710677, %v3576_v33 }
 0x134   : > { %v2058_v25 = vpop.eup %2057  ;;  %v1440_v22 = vmul.f32 %v1296_v44, %v1152_v51  ;;  %v1297_v6 = vmul.f32 %v1153_v3, %v1009_v40  ;;  %v1154_v49 = vmul.f32 %v722_v41, %v3495_v36  ;;  %v723_v9 = vadd.f32 1.0, %v2056_v17 }
 0x135   : > { %v2060_v45 = vpop.eup %2059  ;;  %v724_v28 = vadd.f32 1.0, %v2058_v25  ;;  %v1017_v30 = vsel %vm873_vm9, -5.0, %v2228_v5  ;;  %2073 = verf.f32 %v444_v42  ;;  %v445_v16 = vmul.f32 0.70710677, %v3589_v55 }
 0x136   : > { %1584 = vst [vmem:[%s2500_s17 + $0x380] sm:$0xff] %v1440_v22  ;;  %v1441_v54 = vmul.f32 %v1297_v6, %v1153_v3  ;;  %v1298_v31 = vmul.f32 %v1154_v49, %v1010_v61  ;;  %v1155_v21 = vmul.f32 %v723_v9, %v3506_v62  ;;  %v725_v0 = vadd.f32 1.0, %v2060_v45  ;;  %v3650_v45 = vld [vmem:[%s2354_s12 + $0x410] sm:$0xff] }
 0x137   : > { %v2062_v4 = vpop.eup %2061  ;;  %v1156_v36 = vmul.f32 %v724_v28, %v3509_v24  ;;  %vm875_vm11 = vcmp.lt.f32.partialorder %v3569_v46, 0.0  ;;  %2075 = verf.f32 %v445_v16  ;;  %v446_v19 = vmul.f32 0.70710677, %v3598_v39 }
 0x138   : > { %v2064_v43 = vpop.eup %2063  ;;  %1585 = vst [vmem:[%s2500_s17 + $0x388] sm:$0xff] %v1441_v54  ;;  %v1442_v7 = vmul.f32 %v1298_v31, %v1154_v49  ;;  %v1299_v47 = vmul.f32 %v1155_v21, %v3555_v23  ;;  %v1157_v13 = vmul.f32 %v725_v0, %v3520_v8  ;;  %v726_v40 = vadd.f32 1.0, %v2062_v4  ;;  %v3617_v8 = vld [vmem:[%s2354_s12 + $0x3f8] sm:$0xff]  ;;  %v3664_v4 = vld [vmem:[%s2354_s12 + $0x420] sm:$0xff] }
 0x139   : > { %v2066_v62 = vpop.eup %2065  ;;  %v1300_v15 = vmul.f32 %v1156_v36, %v3563_v2  ;;  %v727_v24 = vadd.f32 1.0, %v2064_v43  ;;  %v1018_v20 = vsel %vm874_vm10, -5.0, %v2228_v5  ;;  %2077 = verf.f32 %v446_v19  ;;  %v3661_v0 = vld [vmem:[%s2354_s12 + $0x418] sm:$0xff] }
 0x13a   : > { %v2068_v18 = vpop.eup %2067  ;;  %1586 = vst [vmem:[%s2500_s17 + $0x390] sm:$0xff] %v1442_v7  ;;  %v1443_v61 = vmul.f32 %v1299_v47, %v1155_v21  ;;  %v1301_v48 = vmul.f32 %v1157_v13, %v1013_v37  ;;  %v1158_v29 = vmul.f32 %v726_v40, %v3533_v27  ;;  %v728_v10 = vadd.f32 1.0, %v2066_v62  ;;  %v3675_v47 = vld [vmem:[%s2354_s12 + $0x428] sm:$0xff] }
 0x13b   : > { %v2070_v23 = vpop.eup %2069  ;;  %v1444_v63 = vmul.f32 %v1300_v15, %v1156_v36  ;;  %v1159_v60 = vmul.f32 %v727_v24, %v3536_v53  ;;  %v729_v2 = vadd.f32 1.0, %v2068_v18  ;;  %v1019_v14 = vsel %vm875_vm11, -5.0, %v2228_v5  ;;  %v3691_v18 = vld [vmem:[%s2354_s12 + $0x438] sm:$0xff] }
 0x13c   : > { %1587 = vst [vmem:[%s2500_s17 + $0x398] sm:$0xff] %v1443_v61  ;;  %v1445_v59 = vmul.f32 %v1301_v48, %v1157_v13  ;;  %v1302_v57 = vmul.f32 %v1158_v29, %v1014_v11  ;;  %v1160_v58 = vmul.f32 %v728_v10, %v3542_v32  ;;  %v730_v27 = vadd.f32 1.0, %v2070_v23  ;;  %v3633_v11 = vld [vmem:[%s2354_s12 + $0x400] sm:$0xff] }
 0x13d   : > { %v2072_v37 = vpop.eup %2071  ;;  %1588 = vst [vmem:[%s2500_s17 + $0x3a0] sm:$0xff] %v1444_v63  ;;  %v1303_v35 = vmul.f32 %v1159_v60, %v3582_v56  ;;  %v1161_v1 = vmul.f32 %v729_v2, %v3547_v52  ;;  %vm876_vm12 = vcmp.lt.f32.partialorder %v3576_v33, 0.0  ;;  %v447_v53 = vmul.f32 0.70710677, %v3617_v8  ;;  %v3697_v10 = vld [vmem:[%s2354_s12 + $0x440] sm:$0xff] }
 0x13e   : > { %1589 = vst [vmem:[%s2500_s17 + $0x3a8] sm:$0xff] %v1445_v59  ;;  %v1446_v51 = vmul.f32 %v1302_v57, %v1158_v29  ;;  %v1304_v26 = vmul.f32 %v1160_v58, %v1016_v50  ;;  %v1162_v38 = vmul.f32 %v730_v27, %v3560_v34  ;;  %v731_v32 = vadd.f32 1.0, %v2072_v37  ;;  %v3639_v50 = vld [vmem:[%s2354_s12 + $0x408] sm:$0xff]  ;;  %v3715_v37 = vld [vmem:[%s2354_s12 + $0x450] sm:$0xff] }
 0x13f   : > { %v2074_v12 = vpop.eup %2073  ;;  %v1447_v44 = vmul.f32 %v1303_v35, %v1159_v60  ;;  %v1305_v56 = vmul.f32 %v1161_v1, %v1017_v30  ;;  %vm877_vm13 = vcmp.lt.f32.partialorder %v3589_v55, 0.0  ;;  %2079 = verf.f32 %v447_v53  ;;  %v3702_v60 = vld [vmem:[%s2354_s12 + $0x448] sm:$0xff] }
 0x140   : > { %1590 = vst [vmem:[%s2500_s17 + $0x3b0] sm:$0xff] %v1446_v51  ;;  %v1448_v52 = vmul.f32 %v1304_v26, %v1160_v58  ;;  %v1306_v3 = vmul.f32 %v1162_v38, %v1018_v20  ;;  %v1163_v41 = vmul.f32 %v731_v32, %v3569_v46  ;;  %v732_v17 = vadd.f32 1.0, %v2074_v12  ;;  %v3688_v20 = vld [vmem:[%s2354_s12 + $0x430] sm:$0xff]  ;;  %v3724_v26 = vld [vmem:[%s2354_s12 + $0x458] sm:$0xff] }
 0x141   : > { %v2076_v34 = vpop.eup %2075  ;;  %1591 = vst [vmem:[%s2500_s17 + $0x3b8] sm:$0xff] %v1447_v44  ;;  %v1449_v42 = vmul.f32 %v1305_v56, %v1161_v1  ;;  %v1020_v25 = vsel %vm876_vm12, -5.0, %v2228_v5  ;;  %vm878_vm14 = vcmp.lt.f32.partialorder %v3598_v39, 0.0  ;;  %v448_v22 = vmul.f32 0.70710677, %v3633_v11 }
 0x142   : > { %1592 = vst [vmem:[%s2500_s17 + $0x3c0] sm:$0xff] %v1448_v52  ;;  %v1450_v6 = vmul.f32 %v1306_v3, %v1162_v38  ;;  %v1307_v46 = vmul.f32 %v1163_v41, %v1019_v14  ;;  %v1164_v49 = vmul.f32 %v732_v17, %v3576_v33  ;;  %v733_v9 = vadd.f32 1.0, %v2076_v34  ;;  %v3731_v3 = vld [vmem:[%s2354_s12 + $0x460] sm:$0xff] }
 0x143   : > { %v2078_v28 = vpop.eup %2077  ;;  %1593 = vst [vmem:[%s2500_s17 + $0x3c8] sm:$0xff] %v1449_v42  ;;  %v1021_v30 = vsel %vm877_vm13, -5.0, %v2228_v5  ;;  %vm879_vm15 = vcmp.lt.f32.partialorder %v3617_v8, 0.0  ;;  %2081 = verf.f32 %v448_v22  ;;  %v449_v16 = vmul.f32 0.70710677, %v3639_v50 }
 0x144   : > { %1594 = vst [vmem:[%s2500_s17 + $0x3d0] sm:$0xff] %v1450_v6  ;;  %v1451_v54 = vmul.f32 %v1307_v46, %v1163_v41  ;;  %v1308_v31 = vmul.f32 %v1164_v49, %v1020_v25  ;;  %v1165_v33 = vmul.f32 %v733_v9, %v3589_v55  ;;  %v734_v21 = vadd.f32 1.0, %v2078_v28  ;;  %v3744_v6 = vld [vmem:[%s2354_s12 + $0x468] sm:$0xff] }
 0x145   : > { %v1022_v36 = vsel %vm878_vm14, -5.0, %v2228_v5  ;;  %vm880_vm0 = vcmp.lt.f32.partialorder %v3633_v11, 0.0  ;;  %2083 = verf.f32 %v449_v16  ;;  %v450_v19 = vmul.f32 0.70710677, %v3650_v45 }
 0x146   : > { %1595 = vst [vmem:[%s2500_s17 + $0x3d8] sm:$0xff] %v1451_v54  ;;  %v1452_v43 = vmul.f32 %v1308_v31, %v1164_v49  ;;  %v1309_v55 = vmul.f32 %v1165_v33, %v1021_v30  ;;  %v1166_v7 = vmul.f32 %v734_v21, %v3598_v39  ;;  %vm881_vm1 = vcmp.lt.f32.partialorder %v3639_v50, 0.0  ;;  %v3753_v31 = vld [vmem:[%s2354_s12 + $0x470] sm:$0xff] }
 0x147   : > { %v1023_v13 = vsel %vm879_vm15, -5.0, %v2228_v5  ;;  %2085 = verf.f32 %v450_v19  ;;  %v451_v40 = vmul.f32 0.70710677, %v3661_v0  ;;  %v452_v62 = vmul.f32 0.70710677, %v3664_v4 }
 0x148   : > { %1596 = vst [vmem:[%s2500_s17 + $0x3e0] sm:$0xff] %v1452_v43  ;;  %v1453_v15 = vmul.f32 %v1309_v55, %v1165_v33  ;;  %v1310_v24 = vmul.f32 %v1166_v7, %v1022_v36  ;;  %v1024_v39 = vsel %vm880_vm0, -5.0, %v2228_v5  ;;  %vm882_vm2 = vcmp.lt.f32.partialorder %v3650_v45, 0.0 }
 0x149   : > { %v2080_v61 = vpop.eup %2079  ;;  %v1025_v48 = vsel %vm881_vm1, -5.0, %v2228_v5  ;;  %2087 = verf.f32 %v451_v40  ;;  %vm883_vm3 = vcmp.lt.f32.partialorder %v3661_v0, 0.0  ;;  %v453_v29 = vmul.f32 0.70710677, %v3675_v47 }
 0x14a   : > { %1597 = vst [vmem:[%s2500_s17 + $0x3e8] sm:$0xff] %v1453_v15  ;;  %v1454_v23 = vmul.f32 %v1310_v24, %v1166_v7  ;;  %v735_v63 = vadd.f32 1.0, %v2080_v61  ;;  %2089 = verf.f32 %v452_v62  ;;  %vm884_vm4 = vcmp.lt.f32.partialorder %v3664_v4, 0.0 }
 0x14b   : > { %v1026_v2 = vsel %vm882_vm2, -5.0, %v2228_v5  ;;  %2091 = verf.f32 %v453_v29  ;;  %v454_v14 = vmul.f32 0.70710677, %v3688_v20  ;;  %v455_v59 = vmul.f32 0.70710677, %v3691_v18 }
 0x14c   : > { %1598 = vst [vmem:[%s2500_s17 + $0x3f0] sm:$0xff] %v1454_v23  ;;  %v1167_v57 = vmul.f32 %v735_v63, %v3617_v8  ;;  %v3710_v58 = vsel %vm883_vm3, -5.0, %v2228_v5  ;;  %vm885_vm5 = vcmp.lt.f32.partialorder %v3675_v47, 0.0  ;;  %v456_v27 = vmul.f32 0.70710677, %v3697_v10 }
 0x14d   : > { %v2082_v35 = vpop.eup %2081  ;;  %v3718_v1 = vsel %vm884_vm4, -5.0, %v2228_v5  ;;  %2093 = verf.f32 %v454_v14  ;;  %vm886_vm6 = vcmp.lt.f32.partialorder %v3688_v20, 0.0  ;;  %v457_v53 = vmul.f32 0.70710677, %v3702_v60 }
 0x14e   : > { %v1311_v8 = vmul.f32 %v1167_v57, %v1023_v13  ;;  %v736_v51 = vadd.f32 1.0, %v2082_v35  ;;  %2095 = verf.f32 %v455_v59  ;;  %vm887_vm7 = vcmp.lt.f32.partialorder %v3691_v18, 0.0 }
 0x14f   : > { %v2084_v38 = vpop.eup %2083  ;;  %v1029_v32 = vsel %vm885_vm5, -5.0, %v2228_v5  ;;  %2097 = verf.f32 %v456_v27  ;;  %vm888_vm8 = vcmp.lt.f32.partialorder %v3697_v10, 0.0  ;;  %v458_v12 = vmul.f32 0.70710677, %v3715_v37 }
 0x150   : > { %v1455_v44 = vmul.f32 %v1311_v8, %v1167_v57  ;;  %v1168_v56 = vmul.f32 %v736_v51, %v3633_v11  ;;  %v737_v52 = vadd.f32 1.0, %v2084_v38  ;;  %2099 = verf.f32 %v457_v53 }
 0x151   : > { %v2086_v41 = vpop.eup %2085  ;;  %v1030_v17 = vsel %vm886_vm6, -5.0, %v2228_v5  ;;  %v3737_v34 = vsel %vm887_vm7, -5.0, %v2228_v5  ;;  %2101 = verf.f32 %v458_v12  ;;  %v459_v42 = vmul.f32 0.70710677, %v3724_v26 }
 0x152   : > { %1599 = vst [vmem:[%s2500_s17 + $0x3f8] sm:$0xff] %v1455_v44  ;;  %v1312_v25 = vmul.f32 %v1168_v56, %v1024_v39  ;;  %v1169_v11 = vmul.f32 %v737_v52, %v3639_v50  ;;  %v738_v22 = vadd.f32 1.0, %v2086_v41  ;;  %vm889_vm9 = vcmp.lt.f32.partialorder %v3702_v60, 0.0 }
 0x153   : > { %v2088_v46 = vpop.eup %2087  ;;  %v1032_v49 = vsel %vm888_vm8, -5.0, %v2228_v5  ;;  %vm890_vm10 = vcmp.lt.f32.partialorder %v3715_v37, 0.0  ;;  %2103 = verf.f32 %v459_v42  ;;  %v460_v9 = vmul.f32 0.70710677, %v3731_v3 }
 0x154   : > { %v2090_v28 = vpop.eup %2089  ;;  %v1456_v30 = vmul.f32 %v1312_v25, %v1168_v56  ;;  %v1313_v16 = vmul.f32 %v1169_v11, %v1025_v48  ;;  %v1170_v50 = vmul.f32 %v738_v22, %v3650_v45  ;;  %v739_v54 = vadd.f32 1.0, %v2088_v46 }
 0x155   : > { %v2092_v33 = vpop.eup %2091  ;;  %v740_v21 = vadd.f32 1.0, %v2090_v28  ;;  %v1033_v36 = vsel %vm889_vm9, -5.0, %v2228_v5  ;;  %2105 = verf.f32 %v460_v9  ;;  %v461_v19 = vmul.f32 0.70710677, %v3744_v6 }
 0x156   : > { %1600 = vst [vmem:[%s2500_s17 + $0x400] sm:$0xff] %v1456_v30  ;;  %v1457_v43 = vmul.f32 %v1313_v16, %v1169_v11  ;;  %v1314_v55 = vmul.f32 %v1170_v50, %v1026_v2  ;;  %v1171_v7 = vmul.f32 %v739_v54, %v3661_v0  ;;  %v741_v13 = vadd.f32 1.0, %v2092_v33 }
 0x157   : > { %v2094_v40 = vpop.eup %2093  ;;  %v1172_v45 = vmul.f32 %v740_v21, %v3664_v4  ;;  %vm891_vm11 = vcmp.lt.f32.partialorder %v3724_v26, 0.0  ;;  %2107 = verf.f32 %v461_v19  ;;  %v462_v62 = vmul.f32 0.70710677, %v3753_v31 }
 0x158   : > { %v2096_v15 = vpop.eup %2095  ;;  %1601 = vst [vmem:[%s2500_s17 + $0x408] sm:$0xff] %v1457_v43  ;;  %v1458_v24 = vmul.f32 %v1314_v55, %v1170_v50  ;;  %v1315_v39 = vmul.f32 %v1171_v7, %v3710_v58  ;;  %v1173_v61 = vmul.f32 %v741_v13, %v3675_v47  ;;  %v742_v48 = vadd.f32 1.0, %v2094_v40  ;;  %v3772_v47 = vld [vmem:[%s2354_s12 + $0x478] sm:$0xff] }
 0x159   : > { %v2098_v0 = vpop.eup %2097  ;;  %v1316_v29 = vmul.f32 %v1172_v45, %v3718_v1  ;;  %v743_v4 = vadd.f32 1.0, %v2096_v15  ;;  %v1034_v23 = vsel %vm890_vm10, -5.0, %v2228_v5  ;;  %2109 = verf.f32 %v462_v62 }
 0x15a   : > { %v2100_v63 = vpop.eup %2099  ;;  %1602 = vst [vmem:[%s2500_s17 + $0x410] sm:$0xff] %v1458_v24  ;;  %v1459_v2 = vmul.f32 %v1315_v39, %v1171_v7  ;;  %v1317_v14 = vmul.f32 %v1173_v61, %v1029_v32  ;;  %v1174_v59 = vmul.f32 %v742_v48, %v3688_v20  ;;  %v744_v57 = vadd.f32 1.0, %v2098_v0 }
 0x15b   : > { %v2102_v58 = vpop.eup %2101  ;;  %v1460_v27 = vmul.f32 %v1316_v29, %v1172_v45  ;;  %v1175_v35 = vmul.f32 %v743_v4, %v3691_v18  ;;  %v745_v1 = vadd.f32 1.0, %v2100_v63  ;;  %v1035_v53 = vsel %vm891_vm11, -5.0, %v2228_v5 }
 0x15c   : > { %1603 = vst [vmem:[%s2500_s17 + $0x418] sm:$0xff] %v1459_v2  ;;  %v1461_v8 = vmul.f32 %v1317_v14, %v1173_v61  ;;  %v1318_v51 = vmul.f32 %v1174_v59, %v1030_v17  ;;  %v1176_v38 = vmul.f32 %v744_v57, %v3697_v10  ;;  %v746_v32 = vadd.f32 1.0, %v2102_v58 }
 0x15d   : > { %v2104_v20 = vpop.eup %2103  ;;  %1604 = vst [vmem:[%s2500_s17 + $0x420] sm:$0xff] %v1460_v27  ;;  %v1319_v12 = vmul.f32 %v1175_v35, %v3737_v34  ;;  %v1177_v44 = vmul.f32 %v745_v1, %v3702_v60  ;;  %vm892_vm12 = vcmp.lt.f32.partialorder %v3731_v3, 0.0  ;;  %v463_v18 = vmul.f32 0.70710677, %v3772_v47 }
 0x15e   : > { %1605 = vst [vmem:[%s2500_s17 + $0x428] sm:$0xff] %v1461_v8  ;;  %v1462_v56 = vmul.f32 %v1318_v51, %v1174_v59  ;;  %v1320_v52 = vmul.f32 %v1176_v38, %v1032_v49  ;;  %v1178_v41 = vmul.f32 %v746_v32, %v3715_v37  ;;  %v747_v17 = vadd.f32 1.0, %v2104_v20 }
 0x15f   : > { %v2106_v10 = vpop.eup %2105  ;;  %v1463_v42 = vmul.f32 %v1319_v12, %v1175_v35  ;;  %v1321_v25 = vmul.f32 %v1177_v44, %v1033_v36  ;;  %vm893_vm13 = vcmp.lt.f32.partialorder %v3744_v6, 0.0  ;;  %2111 = verf.f32 %v463_v18 }
 0x160   : > { %1606 = vst [vmem:[%s2500_s17 + $0x430] sm:$0xff] %v1462_v56  ;;  %v1464_v60 = vmul.f32 %v1320_v52, %v1176_v38  ;;  %v1322_v34 = vmul.f32 %v1178_v41, %v1034_v23  ;;  %v1179_v11 = vmul.f32 %v747_v17, %v3724_v26  ;;  %v748_v22 = vadd.f32 1.0, %v2106_v10 }
 0x161   : > { %v2108_v46 = vpop.eup %2107  ;;  %1607 = vst [vmem:[%s2500_s17 + $0x438] sm:$0xff] %v1463_v42  ;;  %v1465_v49 = vmul.f32 %v1321_v25, %v1177_v44  ;;  %v1036_v37 = vsel %vm892_vm12, -5.0, %v2228_v5  ;;  %vm894_vm14 = vcmp.lt.f32.partialorder %v3753_v31, 0.0  ;;  %v1037_v26 = vsel %vm893_vm13, -5.0, %v2228_v5 }
 0x162   : > { %1608 = vst [vmem:[%s2500_s17 + $0x440] sm:$0xff] %v1464_v60  ;;  %v1466_v9 = vmul.f32 %v1322_v34, %v1178_v41  ;;  %v1323_v28 = vmul.f32 %v1179_v11, %v1035_v53  ;;  %v1180_v30 = vmul.f32 %v748_v22, %v3731_v3  ;;  %v749_v16 = vadd.f32 1.0, %v2108_v46 }
 0x163   : > { %v2110_v50 = vpop.eup %2109  ;;  %1609 = vst [vmem:[%s2500_s17 + $0x448] sm:$0xff] %v1465_v49  ;;  %v1038_v19 = vsel %vm894_vm14, -5.0, %v2228_v5  ;;  %vm895_vm15 = vcmp.lt.f32.partialorder %v3772_v47, 0.0 }
 0x164   : > { %1610 = vst [vmem:[%s2500_s17 + $0x450] sm:$0xff] %v1466_v9  ;;  %v1467_v54 = vmul.f32 %v1323_v28, %v1179_v11  ;;  %v1324_v33 = vmul.f32 %v1180_v30, %v1036_v37  ;;  %v1181_v21 = vmul.f32 %v749_v16, %v3744_v6  ;;  %v750_v36 = vadd.f32 1.0, %v2110_v50 }
 0x165   : > { %v1039_v62 = vsel %vm895_vm15, -5.0, %v2228_v5 }
 0x166   : > { %1611 = vst [vmem:[%s2500_s17 + $0x458] sm:$0xff] %v1467_v54  ;;  %v1468_v43 = vmul.f32 %v1324_v33, %v1180_v30  ;;  %v1325_v3 = vmul.f32 %v1181_v21, %v1037_v26  ;;  %v1182_v55 = vmul.f32 %v750_v36, %v3753_v31 }
 0x168   : > { %1612 = vst [vmem:[%s2500_s17 + $0x460] sm:$0xff] %v1468_v43  ;;  %v1469_v7 = vmul.f32 %v1325_v3, %v1181_v21  ;;  %v1326_v13 = vmul.f32 %v1182_v55, %v1038_v19 }
 0x169   : > { %v2112_v40 = vpop.eup %2111 }
 0x16a   : > { %1613 = vst [vmem:[%s2500_s17 + $0x468] sm:$0xff] %v1469_v7  ;;  %v1470_v45 = vmul.f32 %v1326_v13, %v1182_v55  ;;  %v751_v6 = vadd.f32 1.0, %v2112_v40 }
 0x16c   : > { %1614 = vst [vmem:[%s2500_s17 + $0x470] sm:$0xff] %v1470_v45  ;;  %v1183_v15 = vmul.f32 %v751_v6, %v3772_v47  ;;  %1623 = sbr.rel (!%p2289_p9) target bundleno = 399 (0x18f), region = 32 }
 0x16e   : > { %v1327_v24 = vmul.f32 %v1183_v15, %v1039_v62 }
 0x170   : > { %v1471_v39 = vmul.f32 %v1327_v24, %v1183_v15 }
 0x172   : > { %1615 = vst [vmem:[%s2500_s17 + $0x478] sm:$0xff] %v1471_v39 }
 0x173   : > { %s3899_s30 = smov (!%p1627_p8, %s1626_s30), 18 }
 0x174   : > { %s3817_s4 = sshll.u32 %s3899_s30, 10 }
 0x175   : > { %s1632_s13 = ssub.s32 18432, %s3817_s4 }
 0x176   : > { %1633 = vsyncadd %s1617_s25, %s1632_s13  ;;  %p1743_p11 = scmp.ne.s32.totalorder %s3817_s4, 0  ;;  %s1762_s18 = smul.u32 18432, %s2215_s9 }
 0x177   : > { %s1641_s15 = sshll.u32 %s2500_s17, 4  ;;  %s2229_s24 = smov [#allocation5]   ;;  %s3830_s15 = int_to_ptr.vmem [resolvable:$true] %s1641_s15 }
 0x178   : > { %s3828_s22 = scalar_lea.hbm %s3882_s1, %s1762_s18  ;;  %s2141_s23 = scalar_lea.vmem %s3830_s15, %s3817_s4 }
 0x179   : > { %p2142_p9 = scmp.ne.s32.totalorder %s3830_s15, %s2141_s23  ;;  %s2145_s26 = sshll.u32 %s2229_s24, 4  ;;  %s2146_s26 = int_to_ptr.vmem [resolvable:$false] %s2145_s26 }
 0x17a   : > { %s2147_s9 = scalar_lea.vmem %s2146_s26, 36864  ;;  %p2148_p13 = scmp.lt.s32.totalorder %s3830_s15, %s2146_s26 }
 0x17b   : > { %p2143_p12 = pnand %p2142_p9, %p1743_p11  ;;  %p2149_p1 = scmp.lt.s32.totalorder %s2147_s9, %s2141_s23 }
 0x17d   : > { %p2144_p0 = pneg %p2143_p12  ;;  %p2150_p2 = por %p2149_p1, %p2148_p13 }
 0x17f   : > { %p2151_p4 = pnand %p2150_p2, %p2144_p0 }
 0x181   : > { %2154 = shalt.err (!%p2151_p4)
}
 0x182   : > { %s2155_s28 = scalar_lea.hbm %s3828_s22, %s3817_s4  ;;  %s2159_s5 = scalar_lea.hbm %s3882_s1, 35840 }
 0x183   : > { %p2156_p5 = scmp.ne.s32.totalorder %s3828_s22, %s2155_s28  ;;  %p2160_p7 = scmp.lt.u32.totalorder %s3828_s22, %s3882_s1 }
 0x184   : > { %p2161_p10 = scmp.lt.u32.totalorder %s2159_s5, %s2155_s28  ;;  %p2163_p9 = scmp.lt.u32.totalorder %s2155_s28, %s3828_s22 }
 0x185   : > { %p2157_p6 = pnand %p2156_p5, %p1743_p11 }
 0x186   : > { %p2162_p8 = por %p2161_p10, %p2160_p7 }
 0x187   : > { %p2158_p3 = pneg %p2157_p6 }
 0x188   : > { %p2164_p12 = por %p2163_p9, %p2162_p8 }
 0x18a   : > { %p2165_p0 = pnand %p2164_p12, %p2158_p3 }
 0x18c   : > { %2168 = shalt.err (!%p2165_p0)
}
 0x18d   : > { %s2230_s27 = smov 128   ;;  %s2231_s30 = smov 8  }
 0x18e   : > { %1647 = dma.vmem_to_hbm [thread:$0]  (%p1743_p11), %s3830_s15, %s3817_s4, %s3828_s22, %s1617_s25, %s2230_s27, %s2230_s27, %s2231_s30  }
 0x18f PF: > { %s1656_s13 = sand.u32 1, %s2203_s6   ;;  %p3887_p13 = scmp.ne.s32.totalorder %s3886_s20, 0 }
 0x190   : > { %p3888_p1 = scmp.ge.s32.totalorder %s2223_s11, 2  ;;  %s1657_s18 = scalar_lea.sflag [#allocation4], %s1656_s13 }
 0x192   : > { %p1768_p2 = pnand %p3888_p1, %p3887_p13 }
 0x194   : > { %2198 = dma.done.wait (!%p1768_p2), %s1657_s18, 18432  }
 0x195   : > { %2200 = vsyncadd (!%p1768_p2), %s1657_s18, 4294948864  ;;  %s17_s11 = sadd.s32 1, %s2223_s11   ;;  %s3889_s6 = smov %s2207_s7 }
 0x196   : > { %p14_p4 = scmp.ge.s32.totalorder %s17_s11, 4   ;;  %s3890_s7 = smov %s2211_s8 }
 0x197   : > { %s3891_s8 = smov %s2294_s19  ;;  %s3892_s9 = smov %s2219_s10 }
 0x198   : > { %s3893_s10 = smov %s3895_s14  ;;  %16 = sbr.rel (!%p14_p4) target bundleno = 6 (0x6), region = 69 }
 0x19f   :  { %1662 = vsyncpa [#allocation3], 1 }
 0x1a0   :  { %1664 = vsyncpa [#allocation3 + $0x1], 1 }
 0x1a1   :  { %1665 = vsyncpa [#allocation4], 1 }
 0x1a2   :  { %1667 = vsyncpa [#allocation4 + $0x1], 1 }

</bundles_post_ra>
